<compile_context>
chip_gen: v7x
topology: tpu7x:2x2x1
jax: 0.10.0
libtpu: 0.0.40
codegen_flags: <defaults>
</compile_context>

<pallas_src>
import jax
import jax.numpy as jnp
from jax.experimental import pallas as pl
from jax.experimental.pallas import tpu as pltpu

BN_EPS = 1e-5
HIDDEN = 512          # ChebConv hidden width (fixed by the module)
HEAD_HIDDEN = 128     # nn.Linear(1536, 128)


# ----------------------------------------------------------------------------
# Fused kernel: 3 branches x (ChebConv+BN+ReLU)x2  ->  head1 (K-reduction over
# branches, replaces torch.cat) -> ReLU -> head2.
# ----------------------------------------------------------------------------
def _fused_forward_kernel(x_ref, w1_ref, s1_ref, w2_ref, s2_ref,
                          wh1_ref, sh1_ref, wh2_ref, sh2_ref,
                          o_ref, acc_ref):
    b = pl.program_id(1)

    @pl.when(b == 0)
    def _():
        acc_ref[...] = jnp.zeros_like(acc_ref)

    # branch b, layer 1: relu(x @ (w*bn_scale) + shift)
    h1 = jnp.dot(x_ref[0], w1_ref[0], preferred_element_type=jnp.float32)
    h1 = jnp.maximum(h1 + s1_ref[0], 0.0)

    # branch b, layer 2
    h2 = jnp.dot(h1.astype(w2_ref.dtype), w2_ref[0],
                 preferred_element_type=jnp.float32)
    h2 = jnp.maximum(h2 + s2_ref[0], 0.0)

    # head1 as a K-reduction over branches: slab b of the 1536-wide input
    acc_ref[...] += jnp.dot(h2.astype(wh1_ref.dtype), wh1_ref[0],
                            preferred_element_type=jnp.float32)

    # finalize: head1 bias + ReLU (Dropout is identity in eval), then head2
    @pl.when(b == pl.num_programs(1) - 1)
    def _():
        f = jnp.maximum(acc_ref[...] + sh1_ref[...], 0.0)
        out = jnp.dot(f.astype(wh2_ref.dtype), wh2_ref[...],
                      preferred_element_type=jnp.float32) + sh2_ref[...]
        o_ref[...] = out.astype(o_ref.dtype)


def _round_up(x, m):
    return (x + m - 1) // m * m


def mmm_chebynet_kan_forward(packed,
                             x_1, edge_index_1, edge_attr_1,
                             x_2, edge_index_2, edge_attr_2,
                             x_3, edge_index_3, edge_attr_3,
                             *, tm_max=256):
    # edge_index / edge_attr are unused: ChebConv with K=1 never applies the
    # graph Laplacian, and dropout_adj only affects edges.
    del edge_index_1, edge_attr_1, edge_index_2, edge_attr_2
    del edge_index_3, edge_attr_3

    n, feat = x_1.shape
    out_ch = packed["wh2"].shape[1]

    x = jnp.stack([x_1, x_2, x_3], axis=0).astype(jnp.bfloat16)   # (3, N, F)

    # Tile the node axis (cap at tm_max for VMEM portability / megacore).
    n_pad = _round_up(n, 8)
    tm = min(tm_max, n_pad)
    n_pad = _round_up(n_pad, tm)
    if n_pad != n:
        x = jnp.pad(x, ((0, 0), (0, n_pad - n), (0, 0)))

    grid = (n_pad // tm, 3)

    out = pl.pallas_call(
        _fused_forward_kernel,
        out_shape=jax.ShapeDtypeStruct((n_pad, out_ch), jnp.float32),
        grid_spec=pltpu.PrefetchScalarGridSpec(
            num_scalar_prefetch=0,
            grid=grid,
            in_specs=[
                pl.BlockSpec((1, tm, feat), lambda m, b: (b, m, 0)),            # x
                pl.BlockSpec((1, feat, HIDDEN), lambda m, b: (b, 0, 0)),        # w1
                pl.BlockSpec((1, 1, HIDDEN), lambda m, b: (b, 0, 0)),           # s1
                pl.BlockSpec((1, HIDDEN, HIDDEN), lambda m, b: (b, 0, 0)),      # w2
                pl.BlockSpec((1, 1, HIDDEN), lambda m, b: (b, 0, 0)),           # s2
                pl.BlockSpec((1, HIDDEN, HEAD_HIDDEN), lambda m, b: (b, 0, 0)), # wh1
                pl.BlockSpec((1, HEAD_HIDDEN), lambda m, b: (0, 0)),            # sh1
                pl.BlockSpec((HEAD_HIDDEN, out_ch), lambda m, b: (0, 0)),       # wh2
                pl.BlockSpec((1, out_ch), lambda m, b: (0, 0)),                 # sh2
            ],
            out_specs=pl.BlockSpec((tm, out_ch), lambda m, b: (m, 0)),
            scratch_shapes=[pltpu.VMEM((tm, HEAD_HIDDEN), jnp.float32)],
        ),
        compiler_params=pltpu.CompilerParams(
            dimension_semantics=("parallel", "arbitrary")),
    )(x, packed["w1"], packed["s1"], packed["w2"], packed["s2"],
      packed["wh1"], packed["sh1"], packed["wh2"], packed["sh2"])

    return out[:n]


# ----------------------------------------------------------------------------
# Parameter construction (deterministic, synthetic) + BN/bias folding.
# ----------------------------------------------------------------------------
def _glorot(key, shape):
    fan_in, fan_out = shape
    lim = jnp.sqrt(6.0 / (fan_in + fan_out))
    return jax.random.uniform(key, shape, jnp.float32, -lim, lim)


def _make_cheb_bn(key, in_dim, out_dim):
    """ChebConv(in,out,K=1) weights with inference BatchNorm folded in."""
    k_w, k_b, k_g, k_be, k_m, k_v = jax.random.split(key, 6)
    w = _glorot(k_w, (in_dim, out_dim))                      # x @ w
    b = jax.random.uniform(k_b, (out_dim,), jnp.float32, -0.1, 0.1)
    gamma = 1.0 + 0.1 * jax.random.normal(k_g, (out_dim,), jnp.float32)
    beta = 0.1 * jax.random.normal(k_be, (out_dim,), jnp.float32)
    mean = 0.1 * jax.random.normal(k_m, (out_dim,), jnp.float32)
    var = jnp.abs(jax.random.normal(k_v, (out_dim,), jnp.float32)) + 0.5
    # (x@w + b - mean)*scale + beta  ==  x@(w*scale) + shift
    scale = gamma / jnp.sqrt(var + BN_EPS)
    shift = (b - mean) * scale + beta
    return w * scale[None, :], shift


def _make_linear(key, in_dim, out_dim):
    k_w, k_b = jax.random.split(key)
    lim = 1.0 / jnp.sqrt(jnp.float32(in_dim))
    w = jax.random.uniform(k_w, (in_dim, out_dim), jnp.float32, -lim, lim)
    b = jax.random.uniform(k_b, (out_dim,), jnp.float32, -lim, lim)
    return w, b


def init_params(key, feature, out_channel):
    keys = jax.random.split(key, 8)
    w1s, s1s, w2s, s2s = [], [], [], []
    for i in range(3):
        w1, s1 = _make_cheb_bn(keys[2 * i], feature, HIDDEN)
        w2, s2 = _make_cheb_bn(keys[2 * i + 1], HIDDEN, HIDDEN)
        w1s.append(w1); s1s.append(s1); w2s.append(w2); s2s.append(s2)
    wh1, bh1 = _make_linear(keys[6], 3 * HIDDEN, HEAD_HIDDEN)
    wh2, bh2 = _make_linear(keys[7], HEAD_HIDDEN, out_channel)

    packed = {
        "w1": jnp.stack(w1s).astype(jnp.bfloat16),           # (3, F, 512)
        "s1": jnp.stack(s1s).reshape(3, 1, HIDDEN),           # (3, 1, 512)
        "w2": jnp.stack(w2s).astype(jnp.bfloat16),            # (3, 512, 512)
        "s2": jnp.stack(s2s).reshape(3, 1, HIDDEN),            # (3, 1, 512)
        # head1 split along its 1536-wide input into the 3 branch slabs
        # (matches torch.cat([x_1, x_2, x_3], dim=1) row order).
        "wh1": wh1.reshape(3, HIDDEN, HEAD_HIDDEN).astype(jnp.bfloat16),
        "sh1": bh1.reshape(1, HEAD_HIDDEN),
        "wh2": wh2.astype(jnp.bfloat16),                       # (128, out)
        "sh2": bh2.reshape(1, out_channel),
    }
    return packed


# ----------------------------------------------------------------------------
# Plain-JAX reference (same packed params, same bf16 cast points as kernel).
# ----------------------------------------------------------------------------
def _reference(packed, x_1, x_2, x_3):
    f32 = jnp.float32
    bf = lambda a: a.astype(jnp.bfloat16).astype(f32)
    xs = jnp.stack([x_1, x_2, x_3]).astype(jnp.bfloat16).astype(f32)
    w1 = packed["w1"].astype(f32)
    w2 = packed["w2"].astype(f32)
    wh1 = packed["wh1"].astype(f32)
    wh2 = packed["wh2"].astype(f32)
    acc = jnp.zeros((x_1.shape[0], HEAD_HIDDEN), f32)
    for b in range(3):
        h1 = jnp.maximum(xs[b] @ w1[b] + packed["s1"][b], 0.0)
        h2 = jnp.maximum(bf(h1) @ w2[b] + packed["s2"][b], 0.0)
        acc = acc + bf(h2) @ wh1[b]
    f = jnp.maximum(acc + packed["sh1"], 0.0)
    return bf(f) @ wh2 + packed["sh2"]


if __name__ == "__main__":
    FEATURE = 16
    OUT_CHANNEL = 8
    N_NODES = 64        # all three graphs share the node count (cat over dim=1)
    N_EDGES = 128

    key = jax.random.PRNGKey(0)
    k_param, k1, k2, k3, ke = jax.random.split(key, 5)
    params = init_params(k_param, FEATURE, OUT_CHANNEL)

    x_1 = jax.random.normal(k1, (N_NODES, FEATURE), jnp.float32)
    x_2 = jax.random.normal(k2, (N_NODES, FEATURE), jnp.float32)
    x_3 = jax.random.normal(k3, (N_NODES, FEATURE), jnp.float32)
    edge_index = jax.random.randint(ke, (2, N_EDGES), 0, N_NODES, jnp.int32)
    edge_attr = jnp.ones((N_EDGES,), jnp.float32)

    out = mmm_chebynet_kan_forward(
        params,
        x_1, edge_index, edge_attr,
        x_2, edge_index, edge_attr,
        x_3, edge_index, edge_attr,
    )
    out = jax.block_until_ready(out)

    ref = _reference(params, x_1, x_2, x_3)
    assert out.shape == (N_NODES, OUT_CHANNEL), out.shape
    max_err = float(jnp.max(jnp.abs(out - ref)))
    assert jnp.allclose(out, ref, atol=2e-3, rtol=2e-3), max_err

    print("KERNEL_OK")
</pallas_src>

<mosaic_0001>
module attributes {stable_mosaic.version = 11 : i64} {
  func.func @_fused_forward_kernel(%arg0: i32, %arg1: i32, %arg2: memref<1x64x16xbf16, #tpu.memory_space<vmem>>, %arg3: memref<1x16x512xbf16, #tpu.memory_space<vmem>>, %arg4: memref<1x1x512xf32, #tpu.memory_space<vmem>>, %arg5: memref<1x512x512xbf16, #tpu.memory_space<vmem>>, %arg6: memref<1x1x512xf32, #tpu.memory_space<vmem>>, %arg7: memref<1x512x128xbf16, #tpu.memory_space<vmem>>, %arg8: memref<1x128xf32, #tpu.memory_space<vmem>>, %arg9: memref<128x8xbf16, #tpu.memory_space<vmem>>, %arg10: memref<1x8xf32, #tpu.memory_space<vmem>>, %arg11: memref<64x8xf32, #tpu.memory_space<vmem>>, %arg12: memref<64x128xf32, #tpu.memory_space<vmem>>) attributes {dimension_semantics = [#tpu.dimension_semantics<parallel>, #tpu.dimension_semantics<arbitrary>], iteration_bounds = array<i64: 1, 3>, scalar_prefetch = 0 : i64, scratch_operands = 1 : i64, tpu.core_type = #tpu.core_type<tc>, window_params = [{transform_indices = @transform_0, window_bounds = array<i64: 1, 64, 16>}, {transform_indices = @transform_1, window_bounds = array<i64: 1, 16, 512>}, {transform_indices = @transform_2, window_bounds = array<i64: 1, 1, 512>}, {transform_indices = @transform_3, window_bounds = array<i64: 1, 512, 512>}, {transform_indices = @transform_4, window_bounds = array<i64: 1, 1, 512>}, {transform_indices = @transform_5, window_bounds = array<i64: 1, 512, 128>}, {pipeline_mode = #tpu.pipeline_mode<synchronous>, transform_indices = @transform_6, window_bounds = array<i64: 1, 128>}, {pipeline_mode = #tpu.pipeline_mode<synchronous>, transform_indices = @transform_7, window_bounds = array<i64: 128, 8>}, {pipeline_mode = #tpu.pipeline_mode<synchronous>, transform_indices = @transform_8, window_bounds = array<i64: 1, 8>}, {transform_indices = @transform_9, window_bounds = array<i64: 64, 8>}]} {
    %c0_i32 = arith.constant 0 : i32
    %0 = arith.cmpi eq, %arg1, %c0_i32 : i32
    %1 = arith.extui %0 : i1 to i32
    %c0_i32_0 = arith.constant 0 : i32
    %2 = arith.cmpi ne, %1, %c0_i32_0 : i32
    scf.if %2 {
      %cst_27 = arith.constant 0.000000e+00 : f32
      %34 = vector.broadcast %cst_27 : f32 to vector<64x128xf32>
      %c0_28 = arith.constant 0 : index
      %c0_29 = arith.constant 0 : index
      %35 = vector.load %arg12[%c0_28, %c0_29] : memref<64x128xf32, #tpu.memory_space<vmem>>, vector<64x128xf32>
      tpu.vector_store %arg12[%c0_28, %c0_29], %34 {strides = array<i32>} : memref<64x128xf32, #tpu.memory_space<vmem>>, vector<64x128xf32>,
    } else {
    }
    %c0 = arith.constant 0 : index
    %c0_1 = arith.constant 0 : index
    %c0_2 = arith.constant 0 : index
    %3 = vector.load %arg2[%c0, %c0_1, %c0_2] : memref<1x64x16xbf16, #tpu.memory_space<vmem>>, vector<1x64x16xbf16>
    %4 = vector.shape_cast %3 : vector<1x64x16xbf16> to vector<64x16xbf16>
    %c0_3 = arith.constant 0 : index
    %c0_4 = arith.constant 0 : index
    %c0_5 = arith.constant 0 : index
    %5 = vector.load %arg3[%c0_3, %c0_4, %c0_5] : memref<1x16x512xbf16, #tpu.memory_space<vmem>>, vector<1x16x512xbf16>
    %6 = vector.shape_cast %5 : vector<1x16x512xbf16> to vector<16x512xbf16>
    %cst = arith.constant dense<0.000000e+00> : vector<64x512xf32>
    %7 = tpu.matmul %4, %6, %cst {dimension_numbers = #tpu.dot_dimension_numbers<[1], [0], [0], [1], [0, 0, 1, 1], [], []>} : vector<64x16xbf16>, vector<16x512xbf16>, vector<64x512xf32> -> vector<64x512xf32>
    %c0_6 = arith.constant 0 : index
    %c0_7 = arith.constant 0 : index
    %c0_8 = arith.constant 0 : index
    %8 = vector.load %arg4[%c0_6, %c0_7, %c0_8] : memref<1x1x512xf32, #tpu.memory_space<vmem>>, vector<1x1x512xf32>
    %9 = vector.shape_cast %8 : vector<1x1x512xf32> to vector<1x512xf32>
    %10 = vector.broadcast %9 : vector<1x512xf32> to vector<64x512xf32>
    %11 = arith.addf %7, %10 : vector<64x512xf32>
    %cst_9 = arith.constant 0.000000e+00 : f32
    %12 = vector.broadcast %cst_9 : f32 to vector<64x512xf32>
    %13 = arith.maximumf %11, %12 : vector<64x512xf32>
    %14 = arith.truncf %13 : vector<64x512xf32> to vector<64x512xbf16>
    %c0_10 = arith.constant 0 : index
    %c0_11 = arith.constant 0 : index
    %c0_12 = arith.constant 0 : index
    %15 = vector.load %arg5[%c0_10, %c0_11, %c0_12] : memref<1x512x512xbf16, #tpu.memory_space<vmem>>, vector<1x512x512xbf16>
    %16 = vector.shape_cast %15 : vector<1x512x512xbf16> to vector<512x512xbf16>
    %cst_13 = arith.constant dense<0.000000e+00> : vector<64x512xf32>
    %17 = tpu.matmul %14, %16, %cst_13 {dimension_numbers = #tpu.dot_dimension_numbers<[1], [0], [0], [1], [0, 0, 1, 1], [], []>} : vector<64x512xbf16>, vector<512x512xbf16>, vector<64x512xf32> -> vector<64x512xf32>
    %c0_14 = arith.constant 0 : index
    %c0_15 = arith.constant 0 : index
    %c0_16 = arith.constant 0 : index
    %18 = vector.load %arg6[%c0_14, %c0_15, %c0_16] : memref<1x1x512xf32, #tpu.memory_space<vmem>>, vector<1x1x512xf32>
    %19 = vector.shape_cast %18 : vector<1x1x512xf32> to vector<1x512xf32>
    %20 = vector.broadcast %19 : vector<1x512xf32> to vector<64x512xf32>
    %21 = arith.addf %17, %20 : vector<64x512xf32>
    %cst_17 = arith.constant 0.000000e+00 : f32
    %22 = vector.broadcast %cst_17 : f32 to vector<64x512xf32>
    %23 = arith.maximumf %21, %22 : vector<64x512xf32>
    %c0_18 = arith.constant 0 : index
    %c0_19 = arith.constant 0 : index
    %24 = vector.load %arg12[%c0_18, %c0_19] : memref<64x128xf32, #tpu.memory_space<vmem>>, vector<64x128xf32>
    %25 = arith.truncf %23 : vector<64x512xf32> to vector<64x512xbf16>
    %c0_20 = arith.constant 0 : index
    %c0_21 = arith.constant 0 : index
    %c0_22 = arith.constant 0 : index
    %26 = vector.load %arg7[%c0_20, %c0_21, %c0_22] : memref<1x512x128xbf16, #tpu.memory_space<vmem>>, vector<1x512x128xbf16>
    %27 = vector.shape_cast %26 : vector<1x512x128xbf16> to vector<512x128xbf16>
    %cst_23 = arith.constant dense<0.000000e+00> : vector<64x128xf32>
    %28 = tpu.matmul %25, %27, %cst_23 {dimension_numbers = #tpu.dot_dimension_numbers<[1], [0], [0], [1], [0, 0, 1, 1], [], []>} : vector<64x512xbf16>, vector<512x128xbf16>, vector<64x128xf32> -> vector<64x128xf32>
    %29 = arith.addf %24, %28 : vector<64x128xf32>
    %c0_24 = arith.constant 0 : index
    %c0_25 = arith.constant 0 : index
    %30 = vector.load %arg12[%c0_24, %c0_25] : memref<64x128xf32, #tpu.memory_space<vmem>>, vector<64x128xf32>
    tpu.vector_store %arg12[%c0_24, %c0_25], %29 {strides = array<i32>} : memref<64x128xf32, #tpu.memory_space<vmem>>, vector<64x128xf32>,
    %c2_i32 = arith.constant 2 : i32
    %31 = arith.cmpi eq, %arg1, %c2_i32 : i32
    %32 = arith.extui %31 : i1 to i32
    %c0_i32_26 = arith.constant 0 : i32
    %33 = arith.cmpi ne, %32, %c0_i32_26 : i32
    scf.if %33 {
      %c0_27 = arith.constant 0 : index
      %c0_28 = arith.constant 0 : index
      %34 = vector.load %arg12[%c0_27, %c0_28] : memref<64x128xf32, #tpu.memory_space<vmem>>, vector<64x128xf32>
      %c0_29 = arith.constant 0 : index
      %c0_30 = arith.constant 0 : index
      %35 = vector.load %arg8[%c0_29, %c0_30] : memref<1x128xf32, #tpu.memory_space<vmem>>, vector<1x128xf32>
      %36 = vector.broadcast %35 : vector<1x128xf32> to vector<64x128xf32>
      %37 = arith.addf %34, %36 : vector<64x128xf32>
      %cst_31 = arith.constant 0.000000e+00 : f32
      %38 = vector.broadcast %cst_31 : f32 to vector<64x128xf32>
      %39 = arith.maximumf %37, %38 : vector<64x128xf32>
      %40 = arith.truncf %39 : vector<64x128xf32> to vector<64x128xbf16>
      %c0_32 = arith.constant 0 : index
      %c0_33 = arith.constant 0 : index
      %41 = vector.load %arg9[%c0_32, %c0_33] : memref<128x8xbf16, #tpu.memory_space<vmem>>, vector<128x8xbf16>
      %cst_34 = arith.constant dense<0.000000e+00> : vector<64x8xf32>
      %42 = tpu.matmul %40, %41, %cst_34 {dimension_numbers = #tpu.dot_dimension_numbers<[1], [0], [0], [1], [0, 0, 1, 1], [], []>} : vector<64x128xbf16>, vector<128x8xbf16>, vector<64x8xf32> -> vector<64x8xf32>
      %c0_35 = arith.constant 0 : index
      %c0_36 = arith.constant 0 : index
      %43 = vector.load %arg10[%c0_35, %c0_36] : memref<1x8xf32, #tpu.memory_space<vmem>>, vector<1x8xf32>
      %44 = vector.broadcast %43 : vector<1x8xf32> to vector<64x8xf32>
      %45 = arith.addf %42, %44 : vector<64x8xf32>
      %c0_37 = arith.constant 0 : index
      %c0_38 = arith.constant 0 : index
      %46 = vector.load %arg11[%c0_37, %c0_38] : memref<64x8xf32, #tpu.memory_space<vmem>>, vector<64x8xf32>
      tpu.vector_store %arg11[%c0_37, %c0_38], %45 {strides = array<i32>} : memref<64x8xf32, #tpu.memory_space<vmem>>, vector<64x8xf32>,
    } else {
    }
    return
  }
  func.func @transform_0(%arg0: i32, %arg1: i32) -> (i32, i32, i32) {
    %c0_i32 = arith.constant 0 : i32
    %c0_i32_0 = arith.constant 0 : i32
    return %arg1, %arg0, %c0_i32 : i32, i32, i32
  }
  func.func @transform_1(%arg0: i32, %arg1: i32) -> (i32, i32, i32) {
    %c0_i32 = arith.constant 0 : i32
    %c0_i32_0 = arith.constant 0 : i32
    %c0_i32_1 = arith.constant 0 : i32
    return %arg1, %c0_i32, %c0_i32_0 : i32, i32, i32
  }
  func.func @transform_2(%arg0: i32, %arg1: i32) -> (i32, i32, i32) {
    %c0_i32 = arith.constant 0 : i32
    %c0_i32_0 = arith.constant 0 : i32
    %c0_i32_1 = arith.constant 0 : i32
    return %arg1, %c0_i32, %c0_i32_0 : i32, i32, i32
  }
  func.func @transform_3(%arg0: i32, %arg1: i32) -> (i32, i32, i32) {
    %c0_i32 = arith.constant 0 : i32
    %c0_i32_0 = arith.constant 0 : i32
    %c0_i32_1 = arith.constant 0 : i32
    return %arg1, %c0_i32, %c0_i32_0 : i32, i32, i32
  }
  func.func @transform_4(%arg0: i32, %arg1: i32) -> (i32, i32, i32) {
    %c0_i32 = arith.constant 0 : i32
    %c0_i32_0 = arith.constant 0 : i32
    %c0_i32_1 = arith.constant 0 : i32
    return %arg1, %c0_i32, %c0_i32_0 : i32, i32, i32
  }
  func.func @transform_5(%arg0: i32, %arg1: i32) -> (i32, i32, i32) {
    %c0_i32 = arith.constant 0 : i32
    %c0_i32_0 = arith.constant 0 : i32
    %c0_i32_1 = arith.constant 0 : i32
    return %arg1, %c0_i32, %c0_i32_0 : i32, i32, i32
  }
  func.func @transform_6(%arg0: i32, %arg1: i32) -> (i32, i32) {
    %c0_i32 = arith.constant 0 : i32
    %c0_i32_0 = arith.constant 0 : i32
    %c0_i32_1 = arith.constant 0 : i32
    return %c0_i32, %c0_i32_0 : i32, i32
  }
  func.func @transform_7(%arg0: i32, %arg1: i32) -> (i32, i32) {
    %c0_i32 = arith.constant 0 : i32
    %c0_i32_0 = arith.constant 0 : i32
    %c0_i32_1 = arith.constant 0 : i32
    return %c0_i32, %c0_i32_0 : i32, i32
  }
  func.func @transform_8(%arg0: i32, %arg1: i32) -> (i32, i32) {
    %c0_i32 = arith.constant 0 : i32
    %c0_i32_0 = arith.constant 0 : i32
    %c0_i32_1 = arith.constant 0 : i32
    return %c0_i32, %c0_i32_0 : i32, i32
  }
  func.func @transform_9(%arg0: i32, %arg1: i32) -> (i32, i32) {
    %c0_i32 = arith.constant 0 : i32
    %c0_i32_0 = arith.constant 0 : i32
    return %arg0, %c0_i32 : i32, i32
  }
}

</mosaic_0001>

<bundles_post_ra>
// kernel: tpu_custom_call.1
= control target key start
LH: loop header
LB: loop body
LE: loop exit
PB: predicated region body
PF: predicated region fallthrough
CT: control target
= control target key end

     0   :  { %s4641_s0 = inlined_call_operand.vmem [shape: bf16[3,64,16], index: 0, kind: input, shape index: {}]   ;;  %s4642_s1 = inlined_call_operand.hbm [shape: bf16[3,16,512], index: 1, kind: input, shape index: {}]   ;;  %s4643_s2 = inlined_call_operand.hbm [shape: f32[3,1,512], index: 2, kind: input, shape index: {}]   ;;  %s4644_s3 = inlined_call_operand.hbm [shape: bf16[3,512,512], index: 3, kind: input, shape index: {}]   ;;  %s4645_s4 = inlined_call_operand.hbm [shape: f32[3,1,512], index: 4, kind: input, shape index: {}]   ;;  %s4646_s5 = inlined_call_operand.hbm [shape: bf16[3,512,128], index: 5, kind: input, shape index: {}]   ;;  %s4647_s6 = inlined_call_operand.hbm [shape: f32[1,128], index: 6, kind: input, shape index: {}]   ;;  %s4648_s7 = inlined_call_operand.vmem [shape: bf16[128,8], index: 7, kind: input, shape index: {}]   ;;  %s4649_s8 = inlined_call_operand.hbm [shape: f32[1,8], index: 8, kind: input, shape index: {}]   ;;  %s4650_s9 = inlined_call_operand.vmem [shape: f32[64,8], index: 9, kind: output, shape index: {}]  }
   0x1   :  { %4669 = sst [smem:[#allocation21_spill]] %s4642_s1 }
   0x2   :  { %4670 = sst [smem:[#allocation22_spill]] %s4643_s2 }
   0x3   :  { %4671 = sst [smem:[#allocation23_spill]] %s4647_s6 }
   0x4   :  { %4672 = sst [smem:[#allocation24_spill]] %s4648_s7 }
   0x5   :  { %4673 = sst [smem:[#allocation25_spill]] %s4650_s9 }
   0x6   :  { %14 = vsyncpa [#allocation4], 0 }
   0x7   :  { %16 = vsyncpa [#allocation4 + $0x1], 0 }
   0x8   :  { %17 = vsyncpa [#allocation6], 0 }
   0x9   :  { %19 = vsyncpa [#allocation6 + $0x1], 0 }
   0xa   :  { %20 = vsyncpa [#allocation9], 0 }
   0xb   :  { %22 = vsyncpa [#allocation9 + $0x1], 0 }
   0xc   :  { %23 = vsyncpa [#allocation12], 0  ;;  %s3892_s30 = smov 0   ;;  %s3894_s10 = smov 0  }
   0xd   :  { %s3896_s11 = smov 0   ;;  %s3898_s12 = smov 0  }
   0xe   :  { %s3900_s13 = smov 0   ;;  %s3902_s14 = smov 0  }
   0xf LB: > { %4674 = sst [smem:[#allocation18_spill]] %s3815_s11  ;;  %s4651_s15 = sadd.s32 4294967295, %s3827_s14   ;;  %s3827_s14 = sphi %s3902_s14, %s29_s14   ;;  %s3823_s13 = sphi %s3900_s13, %s4711_s13   ;;  %s3819_s12 = sphi %s3898_s12, %s4710_s12   ;;  %s3815_s11 = sphi %s3896_s11, %s4706_s11   ;;  %s3811_s10 = sphi %s3894_s10, %s4709_s10   ;;  %s3807_s30 = sphi %s3892_s30, %s4708_s30  }
  0x10   : > { %p83_p0 = scmp.ne.s32.totalorder %s3815_s11, %s3811_s10  ;;  %p84_p1 = scmp.eq.s32.totalorder %s3827_s14, 0 }
  0x11   : > { %p89_p2 = scmp.ne.s32.totalorder %s3811_s10, %s3807_s30  ;;  %p3928_p3 = scmp.eq.s32.totalorder %s4651_s15, 0 }
  0x12   : > { %p85_p4 = por %p84_p1, %p83_p0  ;;  %p2792_p5 = scmp.ge.s32.totalorder %s3827_s14, 1 }
  0x13   : > { %s4675_s17 = scalar_select %p3928_p3, 1, 0 }
  0x14   : > { %p3935_p6 = por %p3928_p3, %p89_p2  ;;  %p293_p7 = scmp.lt.s32.totalorder %s3827_s14, 4 }
  0x15   : > { %s3829_s20 = smov [#allocation11]   ;;  %p3258_p10 = scmp.lt.s32.totalorder %s3827_s14, 3 }
  0x16   : > { %s4676_s18 = scalar_select %p3935_p6, 1, 0 }
  0x17   : > { %p3940_p8 = pnand %p2792_p5, %p293_p7  ;;  %s306_s21 = sshll.u32 %s3829_s20, 4  ;;  %s307_s21 = int_to_ptr.vmem [resolvable:$true] %s306_s21 }
  0x18   : > { %s3948_s22 = sand.u32 1, %s3815_s11   ;;  %p3956_p12 = pnand %p3258_p10, %p85_p4 }
  0x19   : > { %s4677_s19 = scalar_select %p3940_p8, 1, 0 }
  0x1a   : > { %p3233_p9 = pneg %p3940_p8  ;;  %s4680_s6 = sld [smem:[#allocation23_spill]] }
  0x1b   : > { %s4679_s24 = scalar_select %p3956_p12, 1, 0 }
  0x1c   : > { %p3952_p11 = pnand %p3233_p9, %p3928_p3 }
  0x1e   : > { %s4678_s23 = scalar_select %p3952_p11, 1, 0 }
  0x1f   : > { %p4661_p0 = pneg %p3952_p11 }
  0x20   : > { %s3559_s28 = scalar_lea.hbm %s4680_s6, 16 }
  0x21   : > { %p3560_p13 = scmp.ne.s32.totalorder %s4680_s6, %s3559_s28  ;;  %p3566_p4 = scmp.lt.u32.totalorder %s3559_s28, %s4680_s6 }
  0x23   : > { %p3562_p1 = pnand %p4661_p0, %p3560_p13 }
  0x25   : > { %p3563_p2 = pneg %p3562_p1 }
  0x27   : > { %p3568_p5 = pnand %p3566_p4, %p3563_p2 }
  0x29   : > { %3571 = shalt.err (!%p3568_p5)
}
  0x2a   : > { %s3572_s16 = scalar_lea.vmem %s307_s21, 16  ;;  %s3579_s26 = scalar_lea.vmem %s307_s21, 32 }
  0x2b   : > { %p3573_p7 = scmp.ne.s32.totalorder %s307_s21, %s3572_s16  ;;  %p3580_p3 = scmp.lt.s32.totalorder %s307_s21, %s307_s21 }
  0x2c   : > { %p3581_p6 = scmp.lt.s32.totalorder %s3579_s26, %s3572_s16 }
  0x2d   : > { %p3575_p9 = pnand %p3573_p7, %p4661_p0 }
  0x2e   : > { %p3582_p8 = por %p3581_p6, %p3580_p3 }
  0x2f   : > { %p3576_p10 = pneg %p3575_p9 }
  0x31   : > { %p3583_p12 = pnand %p3582_p8, %p3576_p10 }
  0x33   : > { %3586 = shalt.err (!%p3583_p12)
}
  0x34   : > { %3236 = dma.hbm_to_vmem [thread:$0]  (!%p3952_p11), %s4680_s6, 16, %s307_s21, [#allocation12]  }
  0x35   : > { %s38_s28 = sadd.s32 1, %s3823_s13  ;;  %s4658_s16 = sshll.u32 %s3948_s22, 2 }
  0x36   : > { %p39_p13 = scmp.ge.s32.totalorder %s38_s28, 3  ;;  %s4659_s29 = sshll.u32 %s3823_s13, 6 }
  0x37   : > { %s4682_s2 = sld [smem:[#allocation22_spill]]  ;;  %s369_s27 = scalar_lea.vmem [#allocation5], %s4658_s16 }
  0x38   : > { %s4713_s28 = smov (%p39_p13, %s38_s28), 0  ;;  %s377_s21 = sshll.u32 %s369_s27, 4  ;;  %s3999_s21 = int_to_ptr.vmem [resolvable:$true] %s377_s21 }
  0x39   : > { %4681 = sst [smem:[#allocation19_spill]] %s4713_s28  ;;  %s73_s15 = ssub.s32 %s3823_s13, %s4713_s28 }
  0x3a   : > { %p4001_p3 = scmp.eq.s32.totalorder %s73_s15, 0  ;;  %s4684_s6 = sand.u32 1, %s3827_s14  }
  0x3b   : > { %s4007_s9 = scalar_lea.sflag [#allocation6], %s4684_s6  ;;  %p4685_p8 = scmp.ne.s32.totalorder %s4679_s24, 0 }
  0x3c   : > { %s4683_s25 = scalar_select %p4001_p3, 1, 0 }
  0x3d   : > { %s3993_s26 = scalar_lea.hbm %s4682_s2, %s4659_s29  ;;  %p4013_p12 = pneg %p4685_p8 }
  0x3e   : > { %s3587_s30 = scalar_lea.hbm %s3993_s26, 64  ;;  %s3592_s15 = scalar_lea.hbm %s4682_s2, 192 }
  0x3f   : > { %p3588_p6 = scmp.ne.s32.totalorder %s3993_s26, %s3587_s30  ;;  %p3593_p4 = scmp.lt.u32.totalorder %s3993_s26, %s4682_s2 }
  0x40   : > { %s4686_s20 = scalar_select %p4013_p12, 1, 0 }
  0x41   : > { %p3590_p1 = pnand %p4013_p12, %p3588_p6  ;;  %p3594_p5 = scmp.lt.u32.totalorder %s3592_s15, %s3587_s30 }
  0x42   : > { %p3596_p9 = scmp.lt.u32.totalorder %s3587_s30, %s3993_s26 }
  0x43   : > { %p3591_p2 = pneg %p3590_p1  ;;  %p3595_p7 = por %p3594_p5, %p3593_p4 }
  0x45   : > { %p3597_p10 = por %p3596_p9, %p3595_p7 }
  0x47   : > { %p3598_p13 = pnand %p3597_p10, %p3591_p2 }
  0x49   : > { %3601 = shalt.err (!%p3598_p13)
}
  0x4a   : > { %s3602_s6 = scalar_lea.vmem %s3999_s21, 64  ;;  %s3830_s16 = smov [#allocation5]  }
  0x4b   : > { %p3603_p6 = scmp.ne.s32.totalorder %s3999_s21, %s3602_s6  ;;  %s3607_s27 = sshll.u32 %s3830_s16, 4  ;;  %s3608_s27 = int_to_ptr.vmem [resolvable:$false] %s3607_s27 }
  0x4c   : > { %s3609_s28 = scalar_lea.vmem %s3608_s27, 128  ;;  %p3610_p11 = scmp.lt.s32.totalorder %s3999_s21, %s3608_s27 }
  0x4d   : > { %p3605_p1 = pnand %p3603_p6, %p4013_p12  ;;  %p3611_p3 = scmp.lt.s32.totalorder %s3609_s28, %s3602_s6 }
  0x4f   : > { %p3606_p0 = pneg %p3605_p1  ;;  %p3612_p4 = por %p3611_p3, %p3610_p11 }
  0x51   : > { %p3613_p5 = pnand %p3612_p4, %p3606_p0 }
  0x53   : > { %3616 = shalt.err (!%p3613_p5)
}
  0x54   : > { %3246 = dma.hbm_to_vmem [thread:$0]  (!%p4685_p8), %s3993_s26, 64, %s3999_s21, %s4007_s9  }
  0x55   : > { %s4687_s29 = sadd.s32 1, %s3815_s11  ;;  %p4688_p2 = scmp.ne.s32.totalorder %s4683_s25, 0 }
  0x56   : > { %s4690_s15 = sshll.u32 %s3823_s13, 6  ;;  %s4691_s28 = sshll.u32 %s3948_s22, 2 }
  0x57   : > { %s4042_s30 = scalar_select %p4688_p2, %s3815_s11, %s4687_s29  }
  0x58   : > { %s4049_s27 = scalar_lea.hbm %s4645_s4, %s4690_s15  ;;  %s409_s2 = scalar_lea.vmem [#allocation8], %s4691_s28 }
  0x59   : > { %4689 = sst [smem:[#allocation20_spill]] %s4042_s30  ;;  %s417_s7 = sshll.u32 %s409_s2, 4  ;;  %s4053_s7 = int_to_ptr.vmem [resolvable:$true] %s417_s7 }
  0x5a   : > { %s3831_s26 = smov [#allocation13]   ;;  %s4692_s25 = sand.u32 1, %s3827_s14  }
  0x5b   : > { %s4055_s21 = sshll.u32 %s3831_s26, 4  ;;  %s4059_s29 = scalar_lea.sflag [#allocation9], %s4692_s25  ;;  %s321_s21 = int_to_ptr.vmem [resolvable:$true] %s4055_s21 }
  0x5c   : > { %s3617_s30 = scalar_lea.hbm %s4049_s27, 64  ;;  %s3622_s16 = scalar_lea.hbm %s4645_s4, 192 }
  0x5d   : > { %p3618_p11 = scmp.ne.s32.totalorder %s4049_s27, %s3617_s30  ;;  %p3623_p7 = scmp.lt.u32.totalorder %s4049_s27, %s4645_s4 }
  0x5e   : > { %p3624_p9 = scmp.lt.u32.totalorder %s3622_s16, %s3617_s30  ;;  %p3626_p13 = scmp.lt.u32.totalorder %s3617_s30, %s4049_s27 }
  0x5f   : > { %p3620_p0 = pnand %p3618_p11, %p4013_p12 }
  0x60   : > { %p3625_p10 = por %p3624_p9, %p3623_p7 }
  0x61   : > { %p3621_p3 = pneg %p3620_p0 }
  0x62   : > { %p3627_p6 = por %p3626_p13, %p3625_p10 }
  0x64   : > { %p3628_p1 = pnand %p3627_p6, %p3621_p3 }
  0x66   : > { %3631 = shalt.err (!%p3628_p1)
}
  0x67   : > { %s3632_s2 = scalar_lea.vmem %s4053_s7, 64  ;;  %s3832_s26 = smov [#allocation8]  }
  0x68   : > { %p3633_p4 = scmp.ne.s32.totalorder %s4053_s7, %s3632_s2  ;;  %s3637_s25 = sshll.u32 %s3832_s26, 4  ;;  %s3638_s25 = int_to_ptr.vmem [resolvable:$false] %s3637_s25 }
  0x69   : > { %s3639_s11 = scalar_lea.vmem %s3638_s25, 128  ;;  %p3640_p11 = scmp.lt.s32.totalorder %s4053_s7, %s3638_s25 }
  0x6a   : > { %p3635_p5 = pnand %p3633_p4, %p4013_p12  ;;  %p3641_p0 = scmp.lt.s32.totalorder %s3639_s11, %s3632_s2 }
  0x6c   : > { %p3636_p2 = pneg %p3635_p5  ;;  %p3642_p7 = por %p3641_p0, %p3640_p11 }
  0x6e   : > { %p3643_p9 = pnand %p3642_p7, %p3636_p2 }
  0x70   : > { %3646 = shalt.err (!%p3643_p9)
}
  0x71   : > { %3252 = dma.hbm_to_vmem [thread:$0]  (!%p4685_p8), %s4049_s27, 64, %s4053_s7, %s4059_s29  }
  0x72   : > { %s3647_s6 = scalar_lea.hbm %s4649_s8, 16  ;;  %p4693_p10 = scmp.ne.s32.totalorder %s4678_s23, 0 }
  0x73   : > { %p3648_p3 = scmp.ne.s32.totalorder %s4649_s8, %s3647_s6  ;;  %p3654_p4 = scmp.lt.u32.totalorder %s3647_s6, %s4649_s8 }
  0x74   : > { %p4694_p13 = pneg %p4693_p10 }
  0x76   : > { %p3650_p6 = pnand %p3648_p3, %p4694_p13 }
  0x78   : > { %p3651_p1 = pneg %p3650_p6 }
  0x7a   : > { %p3656_p5 = pnand %p3654_p4, %p3651_p1 }
  0x7c   : > { %3659 = shalt.err (!%p3656_p5)
}
  0x7d   : > { %s3660_s7 = scalar_lea.vmem %s321_s21, 16  ;;  %p4695_p11 = pmov %p4694_p13 }
  0x7e   : > { %p3661_p2 = scmp.ne.s32.totalorder %s321_s21, %s3660_s7  ;;  %s3667_s27 = scalar_lea.vmem %s321_s21, 32 }
  0x7f   : > { %p3668_p9 = scmp.lt.s32.totalorder %s321_s21, %s321_s21  ;;  %p3669_p8 = scmp.lt.s32.totalorder %s3667_s27, %s3660_s7 }
  0x80   : > { %p3663_p0 = pnand %p3661_p2, %p4695_p11 }
  0x81   : > { %p3670_p12 = por %p3669_p8, %p3668_p9 }
  0x82   : > { %p3664_p7 = pneg %p3663_p0 }
  0x84   : > { %p3671_p3 = pnand %p3670_p12, %p3664_p7 }
  0x86   : > { %3674 = shalt.err (!%p3671_p3)
}
  0x87   : > { %3239 = dma.hbm_to_vmem [thread:$0]  (!%p4693_p10), %s4649_s8, 16, %s321_s21, [#allocation12]  }
  0x88   : > { %s2796_s30 = sshll.u32 %s3948_s22, 5  ;;  %s3013_s15 = sshll.u32 %s3823_s13, 9 }
  0x89   : > { %s4696_s1 = sld [smem:[#allocation21_spill]]  ;;  %s348_s23 = scalar_lea.vmem [#allocation3], %s2796_s30 }
  0x8a   : > { %s355_s2 = sshll.u32 %s348_s23, 4  ;;  %s345_s26 = scalar_lea.sflag [#allocation4], %s3948_s22  ;;  %s4111_s2 = int_to_ptr.vmem [resolvable:$true] %s355_s2 }
  0x8b   : > { %p4697_p12 = scmp.ne.s32.totalorder %s4686_s20, 0 }
  0x8f   : > { %s4109_s28 = scalar_lea.hbm %s4696_s1, %s3013_s15  ;;  %s3680_s25 = scalar_lea.hbm %s4696_s1, 1536 }
  0x90   : > { %s3675_s7 = scalar_lea.hbm %s4109_s28, 512  ;;  %p3681_p6 = scmp.lt.u32.totalorder %s4109_s28, %s4696_s1 }
  0x91   : > { %p3676_p8 = scmp.ne.s32.totalorder %s4109_s28, %s3675_s7  ;;  %p3682_p1 = scmp.lt.u32.totalorder %s3680_s25, %s3675_s7 }
  0x92   : > { %p3684_p5 = scmp.lt.u32.totalorder %s3675_s7, %s4109_s28 }
  0x93   : > { %p3678_p10 = pnand %p3676_p8, %p4697_p12  ;;  %p3683_p4 = por %p3682_p1, %p3681_p6 }
  0x95   : > { %p3679_p13 = pneg %p3678_p10  ;;  %p3685_p2 = por %p3684_p5, %p3683_p4 }
  0x97   : > { %p3686_p11 = pnand %p3685_p2, %p3679_p13 }
  0x99   : > { %3689 = shalt.err (!%p3686_p11)
}
  0x9a   : > { %s3690_s30 = scalar_lea.vmem %s4111_s2, 512  ;;  %s3833_s6 = smov [#allocation3]  }
  0x9b   : > { %p3691_p0 = scmp.ne.s32.totalorder %s4111_s2, %s3690_s30  ;;  %s3695_s16 = sshll.u32 %s3833_s6, 4  ;;  %s3696_s16 = int_to_ptr.vmem [resolvable:$false] %s3695_s16 }
  0x9c   : > { %s3697_s23 = scalar_lea.vmem %s3696_s16, 1024  ;;  %p3698_p3 = scmp.lt.s32.totalorder %s4111_s2, %s3696_s16 }
  0x9d   : > { %p3693_p7 = pnand %p3691_p0, %p4697_p12  ;;  %p3699_p8 = scmp.lt.s32.totalorder %s3697_s23, %s3690_s30 }
  0x9f   : > { %p3694_p9 = pneg %p3693_p7  ;;  %p3700_p10 = por %p3699_p8, %p3698_p3 }
  0xa1   : > { %p3701_p6 = pnand %p3700_p10, %p3694_p9 }
  0xa3   : > { %3704 = shalt.err (!%p3701_p6)
}
  0xa4   : > { %s3834_s7 = smov 256   ;;  %s3835_s21 = smov 16  }
  0xa5   : > { %p4698_p13 = scmp.ne.s32.totalorder %s4679_s24, 0  ;;  %s2802_s27 = sshll.u32 %s3948_s22, 10 }
  0xa6   : > { %s3015_s25 = sshll.u32 %s3823_s13, 14  ;;  %s388_s6 = scalar_lea.vmem [#allocation7], %s2802_s27 }
  0xa7   : > { %3243 = dma.hbm_to_vmem [thread:$0]  (!%p4698_p13), %s4109_s28, 512, %s4111_s2, %s345_s26, %s3834_s7, %s3834_s7, %s3835_s21  }
  0xa8   : > { %s4145_s30 = scalar_lea.hbm %s4644_s3, %s3015_s25  ;;  %s395_s16 = sshll.u32 %s388_s6, 4  ;;  %s4148_s16 = int_to_ptr.vmem [resolvable:$true] %s395_s16 }
  0xa9   : > { %s2808_s23 = sshll.u32 %s3948_s22, 8  ;;  %s3705_s1 = scalar_lea.hbm %s4145_s30, 16384 }
  0xaa   : > { %p3706_p1 = scmp.ne.s32.totalorder %s4145_s30, %s3705_s1  ;;  %s3710_s26 = scalar_lea.hbm %s4644_s3, 49152 }
  0xab   : > { %p3711_p2 = scmp.lt.u32.totalorder %s4145_s30, %s4644_s3  ;;  %p3712_p11 = scmp.lt.u32.totalorder %s3710_s26, %s3705_s1 }
  0xac   : > { %p3708_p4 = pnand %p3706_p1, %p4697_p12  ;;  %p3714_p7 = scmp.lt.u32.totalorder %s3705_s1, %s4145_s30 }
  0xad   : > { %p3713_p0 = por %p3712_p11, %p3711_p2 }
  0xae   : > { %p3709_p5 = pneg %p3708_p4 }
  0xaf   : > { %p3715_p9 = por %p3714_p7, %p3713_p0 }
  0xb1   : > { %p3716_p3 = pnand %p3715_p9, %p3709_p5 }
  0xb3   : > { %3719 = shalt.err (!%p3716_p3)
}
  0xb4   : > { %s3720_s27 = scalar_lea.vmem %s4148_s16, 16384  ;;  %s3836_s15 = smov [#allocation7]  }
  0xb5   : > { %p3721_p8 = scmp.ne.s32.totalorder %s4148_s16, %s3720_s27  ;;  %s3725_s6 = sshll.u32 %s3836_s15, 4  ;;  %s3726_s6 = int_to_ptr.vmem [resolvable:$false] %s3725_s6 }
  0xb6   : > { %s3727_s28 = scalar_lea.vmem %s3726_s6, 32768  ;;  %p3728_p1 = scmp.lt.s32.totalorder %s4148_s16, %s3726_s6 }
  0xb7   : > { %p3723_p10 = pnand %p3721_p8, %p4697_p12  ;;  %p3729_p4 = scmp.lt.s32.totalorder %s3727_s28, %s3720_s27 }
  0xb9   : > { %p3724_p6 = pneg %p3723_p10  ;;  %p3730_p2 = por %p3729_p4, %p3728_p1 }
  0xbb   : > { %p3731_p11 = pnand %p3730_p2, %p3724_p6 }
  0xbd   : > { %3734 = shalt.err (!%p3731_p11)
}
  0xbe   : > { %3249 = dma.hbm_to_vmem [thread:$0]  (!%p4698_p13), %s4145_s30, 16384, %s4148_s16, %s4007_s9, %s3834_s7, %s3834_s7, %s3835_s21  }
  0xbf   : > { %s3017_s1 = sshll.u32 %s3823_s13, 12  ;;  %s428_s2 = scalar_lea.vmem [#allocation10], %s2808_s23 }
  0xc0   : > { %s435_s26 = sshll.u32 %s428_s2, 4  ;;  %s4181_s27 = scalar_lea.hbm %s4646_s5, %s3017_s1  ;;  %s4183_s26 = int_to_ptr.vmem [resolvable:$true] %s435_s26 }
  0xc1   : > { %s3735_s15 = scalar_lea.hbm %s4181_s27, 4096  ;;  %s3740_s7 = scalar_lea.hbm %s4646_s5, 12288 }
  0xc2   : > { %p3736_p5 = scmp.ne.s32.totalorder %s4181_s27, %s3735_s15  ;;  %p3741_p9 = scmp.lt.u32.totalorder %s4181_s27, %s4646_s5 }
  0xc3   : > { %p3742_p3 = scmp.lt.u32.totalorder %s3740_s7, %s3735_s15  ;;  %p3744_p10 = scmp.lt.u32.totalorder %s3735_s15, %s4181_s27 }
  0xc4   : > { %p3738_p0 = pnand %p3736_p5, %p4697_p12 }
  0xc5   : > { %p3743_p8 = por %p3742_p3, %p3741_p9 }
  0xc6   : > { %p3739_p7 = pneg %p3738_p0 }
  0xc7   : > { %p3745_p6 = por %p3744_p10, %p3743_p8 }
  0xc9   : > { %p3746_p1 = pnand %p3745_p6, %p3739_p7 }
  0xcb   : > { %3749 = shalt.err (!%p3746_p1)
}
  0xcc   : > { %s3750_s16 = scalar_lea.vmem %s4183_s26, 4096  ;;  %s3837_s23 = smov [#allocation10]  }
  0xcd   : > { %p3751_p4 = scmp.ne.s32.totalorder %s4183_s26, %s3750_s16  ;;  %s3755_s6 = sshll.u32 %s3837_s23, 4  ;;  %s3756_s6 = int_to_ptr.vmem [resolvable:$false] %s3755_s6 }
  0xce   : > { %s3757_s28 = scalar_lea.vmem %s3756_s6, 8192  ;;  %p3758_p5 = scmp.lt.s32.totalorder %s4183_s26, %s3756_s6 }
  0xcf   : > { %p3753_p2 = pnand %p3751_p4, %p4697_p12  ;;  %p3759_p0 = scmp.lt.s32.totalorder %s3757_s28, %s3750_s16 }
  0xd1   : > { %p3754_p11 = pneg %p3753_p2  ;;  %p3760_p9 = por %p3759_p0, %p3758_p5 }
  0xd3   : > { %p3761_p3 = pnand %p3760_p9, %p3754_p11 }
  0xd5   : > { %3764 = shalt.err (!%p3761_p3)
}
  0xd6   : > { %s3838_s1 = smov 64   ;;  %s3839_s2 = smov 4  }
  0xd7   : > { %3255 = dma.hbm_to_vmem [thread:$0]  (!%p4698_p13), %s4181_s27, 4096, %s4183_s26, %s4059_s29, %s3838_s1, %s3838_s1, %s3839_s2  }
  0xd8   : > { %p4699_p12 = scmp.ne.s32.totalorder %s4677_s19, 0 }
  0xd9   : > { %s449_s20 = sand.u32 (!%p4699_p12), 1, %s3811_s10   ;;  %p4700_p7 = scmp.ne.s32.totalorder (!%p4699_p12), %s4676_s18, 0 }
  0xda   : > { %447 = sbr.rel (%p4699_p12) target bundleno = 1237 (0x4d5), region = 56  ;;  %s2812_s25 = sshll.u32 (!%p4699_p12), %s449_s20, 5 }
  0xdb   : > { %s450_s11 = scalar_lea.sflag (!%p4699_p12), [#allocation4], %s449_s20  ;;  %s4210_s15 = scalar_lea.vmem (!%p4699_p12), [#allocation3], %s2812_s25 }
  0xe1   : > { %3790 = dma.done.wait (%p4700_p7), %s450_s11, 512  }
  0xe2   : > { %3792 = vsyncadd (%p4700_p7), %s450_s11, 4294966784  ;;  %s4701_s9 = sadd.s32 4294967295, %s3827_s14   ;;  %s2813_s29 = sshll.u32 %s449_s20, 2 }
  0xe3   : > { %s458_s24 = sand.u32 1, %s4701_s9   ;;  %s4218_s19 = scalar_lea.vmem [#allocation5], %s2813_s29 }
  0xe4   : > { %s459_s26 = scalar_lea.sflag [#allocation6], %s458_s24 }
  0xe5   : > { %3794 = dma.done.wait (%p4700_p7), %s459_s26, 16448  }
  0xe6   : > { %3796 = vsyncadd (%p4700_p7), %s459_s26, 4294950848  ;;  %s2814_s27 = sshll.u32 %s449_s20, 10  ;;  %s477_s7 = scalar_lea.sflag [#allocation9], %s458_s24 }
  0xe7   : > { %s4224_s22 = scalar_lea.vmem [#allocation7], %s2814_s27  ;;  %s4226_s21 = scalar_lea.vmem [#allocation8], %s2813_s29 }
  0xe8   : > { %3798 = dma.done.wait (%p4700_p7), %s477_s7, 4160  }
  0xe9   : > { %3800 = vsyncadd (%p4700_p7), %s477_s7, 4294963136  ;;  %s2816_s30 = sshll.u32 %s449_s20, 8  ;;  %p4702_p13 = scmp.ne.s32.totalorder %s4675_s17, 0 }
  0xea   : > { %s4232_s16 = scalar_lea.vmem [#allocation10], %s2816_s30 }
  0xeb   : > { %3802 = dma.done.wait (%p4702_p13), [#allocation12], 32  }
  0xec   : > { %3804 = vsyncadd (%p4702_p13), [#allocation12], 4294967264  ;;  %p562_p8 = scmp.lt.s32.totalorder %s3819_s12, 2  ;;  %p2821_p10 = scmp.ne.s32.totalorder %s3819_s12, 0 }
  0xed   : > { %v3840_v0 = vmov (!%p2821_p10), 0.0  }
  0xee   : > { %s563_s23 = scalar_select %p562_p8, %s3819_s12, 2 }
  0xef   : > { %581 = sbr.rel (%p2821_p10) target bundleno = 246 (0xf6), region = 88  ;;  %582 = vst [vmem:[#allocation2] sm:$0xff] (!%p2821_p10), %v3840_v0  ;;  %583 = vst [vmem:[#allocation2 + $0x8] sm:$0xff] (!%p2821_p10), %v3840_v0 }
  0xf0   : > { %s3018_s6 = sshll.u32 %s563_s23, 5  ;;  %584 = vst [vmem:[#allocation2 + $0x10] sm:$0xff] (!%p2821_p10), %v3840_v0  ;;  %585 = vst [vmem:[#allocation2 + $0x18] sm:$0xff] (!%p2821_p10), %v3840_v0 }
  0xf1   : > { %s4243_s2 = scalar_lea.vmem %s4641_s0, %s3018_s6  ;;  %586 = vst [vmem:[#allocation2 + $0x20] sm:$0xff] (!%p2821_p10), %v3840_v0  ;;  %587 = vst [vmem:[#allocation2 + $0x28] sm:$0xff] (!%p2821_p10), %v3840_v0 }
  0xf2   : > { %588 = vst [vmem:[#allocation2 + $0x30] sm:$0xff] (!%p2821_p10), %v3840_v0  ;;  %589 = vst [vmem:[#allocation2 + $0x38] sm:$0xff] (!%p2821_p10), %v3840_v0 }
  0xf6 PF: > { %v3317_v1 = vld [vmem:[%s4210_s15 + $0x4] ss:$16 sps:$4 sm:$0xff]   ;;  %v3319_v2 = vld [vmem:[%s4210_s15] ss:$16 sps:$4 sm:$0xff]   ;;  %v3841_v3 = vmov 0   ;;  %vm664_vm0 = vcmask 130048  }
  0xf7   : > { %709 = vmatprep.mubr.bf16.mxu0 %v3841_v3  ;;  %782 = vmatprep.mubr.bf16.mxu1 %v3841_v3  ;;  %v3320_v4 = vld [vmem:[%s4243_s2] sm:$0xff]   ;;  %v3324_v5 = vld [vmem:[%s4210_s15 + $0xc] ss:$16 sps:$4 sm:$0xff]   ;;  %v3326_v6 = vld [vmem:[%s4210_s15 + $0x8] ss:$16 sps:$4 sm:$0xff]   ;;  %p2998_p6 = scmp.ne.s32.totalorder %s3819_s12, 2 }
  0xf8   : > { %677 = vmatprep.subr.bf16.mxu0 %v3317_v1  ;;  %v3327_v7 = vld [vmem:[%s4224_s22] ss:$16 sps:$4 sm:$0xff]   ;;  %v3329_v8 = vld [vmem:[%s4224_s22 + $0x4] ss:$16 sps:$4 sm:$0xff]   ;;  %750 = vmatprep.subr.bf16.mxu1 %v3324_v5  ;;  %v3330_v9 = vld [vmem:[%s4224_s22 + $0x8] ss:$16 sps:$4 sm:$0xff]  }
  0xf9   : > { %678 = vmatpush1.bf16.msra.mxu0 %v3319_v2  ;;  %751 = vmatpush1.bf16.msra.mxu1 %v3326_v6  ;;  %v3332_v10 = vld [vmem:[%s4224_s22 + $0xc] ss:$16 sps:$4 sm:$0xff]   ;;  %v3321_v11 = vld [vmem:[%s4243_s2 + $0x8] sm:$0xff]   ;;  %v3336_v15 = vld [vmem:[%s4224_s22 + $0x28] ss:$16 sps:$4 sm:$0xff]   ;;  %s4703_s20 = sld [smem:[#allocation24_spill]] (!%p2998_p6) }
  0xfa   : > { %1661 = vmatprep.subr.bf16.mxu0 %v3329_v8  ;;  %v3335_v12 = vld [vmem:[%s4224_s22 + $0x24] ss:$16 sps:$4 sm:$0xff]   ;;  %1807 = vmatprep.subr.bf16.mxu1 %v3332_v10  ;;  %v3333_v13 = vld [vmem:[%s4224_s22 + $0x20] ss:$16 sps:$4 sm:$0xff]   ;;  %v3338_v14 = vld [vmem:[%s4224_s22 + $0x2c] ss:$16 sps:$4 sm:$0xff]  }
  0xfb   : > { %v3341_v16 = vld [vmem:[%s4224_s22 + $0x44] ss:$16 sps:$4 sm:$0xff]   ;;  %v3344_v17 = vld [vmem:[%s4224_s22 + $0x4c] ss:$16 sps:$4 sm:$0xff]   ;;  %v3339_v18 = vld [vmem:[%s4224_s22 + $0x40] ss:$16 sps:$4 sm:$0xff]  }
  0xfc   : > { %2830 = vmatmul.mubr.msk.bf16.vlgmr.msra.gmra.mrb[0].mxu0 %vm664_vm0, %v3320_v4  ;;  %2834 = vmatmul.mubr.msk.bf16.vlgmr.msra.gmra.mrb[0].mxu1 %vm664_vm0, %v3320_v4  ;;  %v3347_v19 = vld [vmem:[%s4224_s22 + $0x64] ss:$16 sps:$4 sm:$0xff]   ;;  %v3342_v20 = vld [vmem:[%s4224_s22 + $0x48] ss:$16 sps:$4 sm:$0xff]   ;;  %v3350_v22 = vld [vmem:[%s4224_s22 + $0x6c] ss:$16 sps:$4 sm:$0xff]  }
  0xfd   : > { %719 = vmatprep.mubr.bf16.mxu0 %v3841_v3  ;;  %1662 = vmatpush1.bf16.msra.mxu0 %v3327_v7  ;;  %v3322_v21 = vld [vmem:[%s4243_s2 + $0x10] sm:$0xff]   ;;  %v3345_v23 = vld [vmem:[%s4224_s22 + $0x60] ss:$16 sps:$4 sm:$0xff]   ;;  %v3353_v24 = vld [vmem:[%s4224_s22 + $0x84] ss:$16 sps:$4 sm:$0xff]   ;;  %vm2586_vm1 = vcmask (!%p2998_p6), 64512  }
  0xfe   : > { %1663 = vmatprep.subr.bf16.mxu0 %v3335_v12  ;;  %792 = vmatprep.mubr.bf16.mxu1 %v3841_v3  ;;  %v3348_v25 = vld [vmem:[%s4224_s22 + $0x68] ss:$16 sps:$4 sm:$0xff]   ;;  %v3356_v26 = vld [vmem:[%s4224_s22 + $0x8c] ss:$16 sps:$4 sm:$0xff]   ;;  %v3351_v27 = vld [vmem:[%s4224_s22 + $0x80] ss:$16 sps:$4 sm:$0xff]   ;;  %v604_v12 = vlaneseq }
  0xff   : > { %1808 = vmatpush1.bf16.msra.mxu1 %v3330_v9  ;;  %v3359_v28 = vld [vmem:[%s4224_s22 + $0xa4] ss:$16 sps:$4 sm:$0xff]   ;;  %v3354_v29 = vld [vmem:[%s4224_s22 + $0x88] ss:$16 sps:$4 sm:$0xff]   ;;  %v3362_v31 = vld [vmem:[%s4224_s22 + $0xac] ss:$16 sps:$4 sm:$0xff]  }
 0x100   : > { %1809 = vmatprep.subr.bf16.mxu1 %v3338_v14  ;;  %v3323_v30 = vld [vmem:[%s4243_s2 + $0x18] sm:$0xff]   ;;  %v3360_v34 = vld [vmem:[%s4224_s22 + $0xa8] ss:$16 sps:$4 sm:$0xff]   ;;  %v3368_v35 = vld [vmem:[%s4224_s22 + $0xcc] ss:$16 sps:$4 sm:$0xff]   ;;  %s4704_s6 = sld [smem:[#allocation25_spill]] (!%p2998_p6) }
 0x101   : > { %1664 = vmatpush1.bf16.msra.mxu0 %v3333_v13  ;;  %v3357_v32 = vld [vmem:[%s4224_s22 + $0xa0] ss:$16 sps:$4 sm:$0xff]   ;;  %v3365_v33 = vld [vmem:[%s4224_s22 + $0xc4] ss:$16 sps:$4 sm:$0xff]   ;;  %v3366_v38 = vld [vmem:[%s4224_s22 + $0xc8] ss:$16 sps:$4 sm:$0xff]  }
 0x102   : > { %1665 = vmatprep.subr.bf16.mxu0 %v3341_v16  ;;  %v3363_v36 = vld [vmem:[%s4224_s22 + $0xc0] ss:$16 sps:$4 sm:$0xff]   ;;  %v3371_v37 = vld [vmem:[%s4224_s22 + $0xe4] ss:$16 sps:$4 sm:$0xff]   ;;  %v3374_v39 = vld [vmem:[%s4224_s22 + $0xec] ss:$16 sps:$4 sm:$0xff]  }
 0x103   : > { %1810 = vmatpush1.bf16.msra.mxu1 %v3336_v15  ;;  %v3369_v40 = vld [vmem:[%s4224_s22 + $0xe0] ss:$16 sps:$4 sm:$0xff]   ;;  %v3377_v41 = vld [vmem:[%s4224_s22 + $0x104] ss:$16 sps:$4 sm:$0xff]   ;;  %v3372_v42 = vld [vmem:[%s4224_s22 + $0xe8] ss:$16 sps:$4 sm:$0xff]  }
 0x104   : > { %2831 = vmatmul.mubr.msk.bf16.gmra.mrb[4].mxu0 %vm664_vm0, %v3321_v11  ;;  %1811 = vmatprep.subr.bf16.mxu1 %v3344_v17  ;;  %v3380_v43 = vld [vmem:[%s4224_s22 + $0x10c] ss:$16 sps:$4 sm:$0xff]   ;;  %v3375_v44 = vld [vmem:[%s4224_s22 + $0x100] ss:$16 sps:$4 sm:$0xff]   ;;  %v3383_v45 = vld [vmem:[%s4224_s22 + $0x124] ss:$16 sps:$4 sm:$0xff]  }
 0x105   : > { %729 = vmatprep.mubr.bf16.mxu0 %v3841_v3  ;;  %1666 = vmatpush1.bf16.msra.mxu0 %v3339_v18  ;;  %v3378_v46 = vld [vmem:[%s4224_s22 + $0x108] ss:$16 sps:$4 sm:$0xff]   ;;  %v3381_v47 = vld [vmem:[%s4224_s22 + $0x120] ss:$16 sps:$4 sm:$0xff]   ;;  %v3386_v48 = vld [vmem:[%s4224_s22 + $0x12c] ss:$16 sps:$4 sm:$0xff]  }
 0x106   : > { %2835 = vmatmul.mubr.msk.bf16.gmra.mrb[4].mxu1 %vm664_vm0, %v3321_v11  ;;  %1667 = vmatprep.subr.bf16.mxu0 %v3347_v19  ;;  %v3384_v49 = vld [vmem:[%s4224_s22 + $0x128] ss:$16 sps:$4 sm:$0xff]   ;;  %v3389_v50 = vld [vmem:[%s4224_s22 + $0x144] ss:$16 sps:$4 sm:$0xff]   ;;  %v3392_v51 = vld [vmem:[%s4224_s22 + $0x14c] ss:$16 sps:$4 sm:$0xff]  }
 0x107   : > { %802 = vmatprep.mubr.bf16.mxu1 %v3841_v3  ;;  %1812 = vmatpush1.bf16.msra.mxu1 %v3342_v20  ;;  %v3387_v52 = vld [vmem:[%s4224_s22 + $0x140] ss:$16 sps:$4 sm:$0xff]   ;;  %v3395_v53 = vld [vmem:[%s4224_s22 + $0x164] ss:$16 sps:$4 sm:$0xff]   ;;  %v3390_v54 = vld [vmem:[%s4224_s22 + $0x148] ss:$16 sps:$4 sm:$0xff]  }
 0x108   : > { %1813 = vmatprep.subr.bf16.mxu1 %v3350_v22  ;;  %v3398_v55 = vld [vmem:[%s4224_s22 + $0x16c] ss:$16 sps:$4 sm:$0xff]   ;;  %v3393_v56 = vld [vmem:[%s4224_s22 + $0x160] ss:$16 sps:$4 sm:$0xff]   ;;  %v3401_v57 = vld [vmem:[%s4224_s22 + $0x184] ss:$16 sps:$4 sm:$0xff]  }
 0x109   : > { %1668 = vmatpush1.bf16.msra.mxu0 %v3345_v23  ;;  %v3396_v58 = vld [vmem:[%s4224_s22 + $0x168] ss:$16 sps:$4 sm:$0xff]   ;;  %v3404_v59 = vld [vmem:[%s4224_s22 + $0x18c] ss:$16 sps:$4 sm:$0xff]   ;;  %v3399_v60 = vld [vmem:[%s4224_s22 + $0x180] ss:$16 sps:$4 sm:$0xff]  }
 0x10a   : > { %1669 = vmatprep.subr.bf16.mxu0 %v3353_v24  ;;  %v3407_v61 = vld [vmem:[%s4224_s22 + $0x1a4] ss:$16 sps:$4 sm:$0xff]   ;;  %v3402_v62 = vld [vmem:[%s4224_s22 + $0x188] ss:$16 sps:$4 sm:$0xff]   ;;  %v3410_v63 = vld [vmem:[%s4224_s22 + $0x1ac] ss:$16 sps:$4 sm:$0xff]  }
 0x10b   : > { %1814 = vmatpush1.bf16.msra.mxu1 %v3348_v25  ;;  %v3405_v0 = vld [vmem:[%s4224_s22 + $0x1a0] ss:$16 sps:$4 sm:$0xff]   ;;  %v3408_v1 = vld [vmem:[%s4224_s22 + $0x1a8] ss:$16 sps:$4 sm:$0xff]   ;;  %v3413_v2 = vld [vmem:[%s4224_s22 + $0x1c4] ss:$16 sps:$4 sm:$0xff]  }
 0x10c   : > { %2832 = vmatmul.mubr.msk.bf16.gmra.mrb[8].mxu0 %vm664_vm0, %v3322_v21  ;;  %1815 = vmatprep.subr.bf16.mxu1 %v3356_v26  ;;  %v3411_v4 = vld [vmem:[%s4224_s22 + $0x1c0] ss:$16 sps:$4 sm:$0xff]   ;;  %v3414_v5 = vld [vmem:[%s4224_s22 + $0x1c8] ss:$16 sps:$4 sm:$0xff]   ;;  %v3419_v6 = vld [vmem:[%s4224_s22 + $0x1e4] ss:$16 sps:$4 sm:$0xff]  }
 0x10d   : > { %739 = vmatprep.mubr.bf16.mxu0 %v3841_v3  ;;  %1670 = vmatpush1.bf16.msra.mxu0 %v3351_v27  ;;  %v3422_v7 = vld [vmem:[%s4224_s22 + $0x1ec] ss:$16 sps:$4 sm:$0xff]   ;;  %v3417_v8 = vld [vmem:[%s4224_s22 + $0x1e0] ss:$16 sps:$4 sm:$0xff]   ;;  %v3420_v9 = vld [vmem:[%s4224_s22 + $0x1e8] ss:$16 sps:$4 sm:$0xff]  }
 0x10e   : > { %2836 = vmatmul.mubr.msk.bf16.gmra.mrb[8].mxu1 %vm664_vm0, %v3322_v21  ;;  %1671 = vmatprep.subr.bf16.mxu0 %v3359_v28  ;;  %v3425_v10 = vld [vmem:[%s4224_s22 + $0x204] ss:$16 sps:$4 sm:$0xff]   ;;  %v3428_v11 = vld [vmem:[%s4224_s22 + $0x20c] ss:$16 sps:$4 sm:$0xff]   ;;  %v4336_v13 = vshrl.u32 %v604_v12, 7 }
 0x10f   : > { %812 = vmatprep.mubr.bf16.mxu1 %v3841_v3  ;;  %1816 = vmatpush1.bf16.msra.mxu1 %v3354_v29  ;;  %v3416_v3 = vld [vmem:[%s4224_s22 + $0x1cc] ss:$16 sps:$4 sm:$0xff]   ;;  %v3438_v12 = vld [vmem:[%s4224_s22 + $0x248] ss:$16 sps:$4 sm:$0xff]  }
 0x110   : > { %1817 = vmatprep.subr.bf16.mxu1 %v3362_v31  ;;  %v606_v14 = vsub.s32 0, %v4336_v13  ;;  %v602_v15 = vld [vmem:[%s4218_s19] sm:$0xf]  ;;  %v610_v16 = vsub.s32 1, %v4336_v13  ;;  %v614_v19 = vsub.s32 2, %v4336_v13  ;;  %v618_v21 = vsub.s32 3, %v4336_v13 }
 0x111   : > { %1672 = vmatpush1.bf16.msra.mxu0 %v3357_v32 }
 0x112   : > { %1673 = vmatprep.subr.bf16.mxu0 %v3365_v33  ;;  %v4343_v17 = vrot.slane %v602_v15, %v606_v14  ;;  %v4347_v18 = vrot.slane %v602_v15, %v610_v16  ;;  %v4356_v28 = vrot.slane %v602_v15, %v614_v19 }
 0x113   : > { %1818 = vmatpush1.bf16.msra.mxu1 %v3360_v34 }
 0x114   : > { %2833 = vmatmul.mubr.msk.bf16.gmra.mrb[12].mxu0 %vm664_vm0, %v3323_v30  ;;  %1819 = vmatprep.subr.bf16.mxu1 %v3368_v35 }
 0x115   : > { %1674 = vmatpush1.bf16.msra.mxu0 %v3363_v36 }
 0x116   : > { %2837 = vmatmul.mubr.msk.bf16.gmra.mrb[12].mxu1 %vm664_vm0, %v3323_v30  ;;  %1675 = vmatprep.subr.bf16.mxu0 %v3371_v37  ;;  %v4361_v30 = vrot.slane %v602_v15, %v618_v21  ;;  %v3423_v37 = vld [vmem:[%s4224_s22 + $0x200] ss:$16 sps:$4 sm:$0xff]   ;;  %v3443_v15 = vld [vmem:[%s4224_s22 + $0x264] ss:$16 sps:$4 sm:$0xff]  }
 0x117   : > { %1820 = vmatpush1.bf16.msra.mxu1 %v3366_v38 }
 0x118   : > { %1821 = vmatprep.subr.bf16.mxu1 %v3374_v39 }
 0x119   : > { %1676 = vmatpush1.bf16.msra.mxu0 %v3369_v40 }
 0x11a   : > { %1677 = vmatprep.subr.bf16.mxu0 %v3377_v41  ;;  %v3426_v41 = vld [vmem:[%s4224_s22 + $0x208] ss:$16 sps:$4 sm:$0xff]  }
 0x11b   : > { %1822 = vmatpush1.bf16.msra.mxu1 %v3372_v42  ;;  %v3431_v42 = vld [vmem:[%s4224_s22 + $0x224] ss:$16 sps:$4 sm:$0xff]  }
 0x11c   : > { %1823 = vmatprep.subr.bf16.mxu1 %v3380_v43 }
 0x11d   : > { %1678 = vmatpush1.bf16.msra.mxu0 %v3375_v44 }
 0x11e   : > { %1679 = vmatprep.subr.bf16.mxu0 %v3383_v45 }
 0x11f   : > { %1824 = vmatpush1.bf16.msra.mxu1 %v3378_v46  ;;  %v3434_v46 = vld [vmem:[%s4224_s22 + $0x22c] ss:$16 sps:$4 sm:$0xff]  }
 0x120   : > { %1825 = vmatprep.subr.bf16.mxu1 %v3386_v48 }
 0x121   : > { %1680 = vmatpush1.bf16.msra.mxu0 %v3381_v47 }
 0x122   : > { %1681 = vmatprep.subr.bf16.mxu0 %v3389_v50 }
 0x123   : > { %1826 = vmatpush1.bf16.msra.mxu1 %v3384_v49 }
 0x124   : > { %1827 = vmatprep.subr.bf16.mxu1 %v3392_v51 }
 0x125   : > { %1682 = vmatpush1.bf16.msra.mxu0 %v3387_v52 }
 0x126   : > { %1683 = vmatprep.subr.bf16.mxu0 %v3395_v53 }
 0x127   : > { %1828 = vmatpush1.bf16.msra.mxu1 %v3390_v54 }
 0x128   : > { %1829 = vmatprep.subr.bf16.mxu1 %v3398_v55 }
 0x129   : > { %1684 = vmatpush1.bf16.msra.mxu0 %v3393_v56 }
 0x12a   : > { %1685 = vmatprep.subr.bf16.mxu0 %v3401_v57 }
 0x12b   : > { %1830 = vmatpush1.bf16.msra.mxu1 %v3396_v58 }
 0x12c   : > { %1831 = vmatprep.subr.bf16.mxu1 %v3404_v59 }
 0x12d   : > { %1686 = vmatpush1.bf16.msra.mxu0 %v3399_v60  ;;  %v3429_v60 = vld [vmem:[%s4224_s22 + $0x220] ss:$16 sps:$4 sm:$0xff]  }
 0x12e   : > { %1687 = vmatprep.subr.bf16.mxu0 %v3407_v61  ;;  %v3432_v61 = vld [vmem:[%s4224_s22 + $0x228] ss:$16 sps:$4 sm:$0xff]  }
 0x12f   : > { %1832 = vmatpush1.bf16.msra.mxu1 %v3402_v62 }
 0x130   : > { %1833 = vmatprep.subr.bf16.mxu1 %v3410_v63 }
 0x131   : > { %1688 = vmatpush1.bf16.msra.mxu0 %v3405_v0 }
 0x132   : > { %1689 = vmatprep.subr.bf16.mxu0 %v3413_v2  ;;  %v3440_v2 = vld [vmem:[%s4224_s22 + $0x24c] ss:$16 sps:$4 sm:$0xff]  }
 0x133   : > { %1834 = vmatpush1.bf16.msra.mxu1 %v3408_v1  ;;  %v3437_v1 = vld [vmem:[%s4224_s22 + $0x244] ss:$16 sps:$4 sm:$0xff]  }
 0x134   : > { %1835 = vmatprep.subr.bf16.mxu1 %v3416_v3 }
 0x135   : > { %1690 = vmatpush1.bf16.msra.mxu0 %v3411_v4 }
 0x136   : > { %1691 = vmatprep.subr.bf16.mxu0 %v3419_v6 }
 0x137   : > { %1836 = vmatpush1.bf16.msra.mxu1 %v3414_v5 }
 0x138   : > { %1837 = vmatprep.subr.bf16.mxu1 %v3422_v7 }
 0x139   : > { %1692 = vmatpush1.bf16.msra.mxu0 %v3417_v8  ;;  %v3435_v8 = vld [vmem:[%s4224_s22 + $0x240] ss:$16 sps:$4 sm:$0xff]  }
 0x13a   : > { %1734 = vmatprep.subr.bf16.mxu0 %v3425_v10 }
 0x13b   : > { %1838 = vmatpush1.bf16.msra.mxu1 %v3420_v9 }
 0x13c   : > { %1880 = vmatprep.subr.bf16.mxu1 %v3428_v11 }
 0x1cf   : > { %v711_v20 = vpop.f32.mrb[0].mxu0  ;;  %v784_v35 = vpop.f32.mrb[0].mxu1 }
 0x1d0   : > { %v712_v22 = vadd.f32 %v711_v20, %v4343_v17  ;;  %v713_v23 = vpop.f32.mrb[1].mxu0  ;;  %v785_v38 = vadd.f32 %v784_v35, %v4356_v28  ;;  %v786_v39 = vpop.f32.mrb[1].mxu1 }
 0x1d1   : > { %v714_v24 = vadd.f32 %v713_v23, %v4347_v18  ;;  %v715_v25 = vpop.f32.mrb[2].mxu0  ;;  %v787_v44 = vadd.f32 %v786_v39, %v4361_v30  ;;  %v788_v45 = vpop.f32.mrb[2].mxu1 }
 0x1d2   : > { %v716_v26 = vadd.f32 %v715_v25, %v4343_v17  ;;  %v717_v27 = vpop.f32.mrb[3].mxu0  ;;  %v823_v31 = vmax.f32 %v712_v22, 0.0  ;;  %v825_v49 = vmax.f32 %v785_v38, 0.0  ;;  %v789_v50 = vadd.f32 %v788_v45, %v4356_v28  ;;  %v790_v51 = vpop.f32.mrb[3].mxu1  ;;  %v3446_v25 = vld [vmem:[%s4224_s22 + $0x26c] ss:$16 sps:$4 sm:$0xff]  }
 0x1d3   : > { %v718_v29 = vadd.f32 %v717_v27, %v4347_v18  ;;  %v824_v33 = vmax.f32 %v714_v24, 0.0  ;;  %v826_v54 = vmax.f32 %v787_v44, 0.0  ;;  %v791_v55 = vadd.f32 %v790_v51, %v4361_v30 }
 0x1d4   : > { %v827_v32 = vmax.f32 %v716_v26, 0.0  ;;  %v829_v59 = vmax.f32 %v789_v50, 0.0 }
 0x1d5   : > { %v828_v34 = vmax.f32 %v718_v29, 0.0  ;;  %v830_v0 = vmax.f32 %v791_v55, 0.0 }
 0x1d6   : > { %v855_v36 = vpack.c.bf16 %v827_v32, %v823_v31  ;;  %v4379_v4 = vpack.c.bf16 %v829_v59, %v825_v49 }
 0x1d7   : > { %v856_v40 = vpack.c.bf16 %v828_v34, %v824_v33  ;;  %v721_v43 = vpop.f32.mrb[4].mxu0  ;;  %v4381_v6 = vpack.c.bf16 %v830_v0, %v826_v54 }
 0x1d8   : > { %v722_v47 = vadd.f32 %v721_v43, %v4343_v17  ;;  %v723_v48 = vpop.f32.mrb[5].mxu0 }
 0x1d9   : > { %1693 = vmatprep.mubr.bf16.mxu0 %v856_v40  ;;  %1839 = vmatprep.mubr.bf16.mxu1 %v856_v40  ;;  %v724_v52 = vadd.f32 %v723_v48, %v4347_v18  ;;  %v725_v53 = vpop.f32.mrb[6].mxu0  ;;  %v794_v7 = vpop.f32.mrb[4].mxu1 }
 0x1da   : > { %1694 = vmatmul.mubr.bf16.vlgmr.msra.gmra.mrb[16].mxu0 %v855_v36  ;;  %1840 = vmatmul.mubr.bf16.vlgmr.msra.gmra.mrb[16].mxu1 %v855_v36  ;;  %v831_v56 = vmax.f32 %v722_v47, 0.0  ;;  %v726_v57 = vadd.f32 %v725_v53, %v4343_v17  ;;  %v727_v58 = vpop.f32.mrb[7].mxu0  ;;  %v795_v10 = vadd.f32 %v794_v7, %v4356_v28  ;;  %v796_v11 = vpop.f32.mrb[5].mxu1  ;;  %v3452_v47 = vld [vmem:[%s4224_s22 + $0x28c] ss:$16 sps:$4 sm:$0xff]  }
 0x1db   : > { %1735 = vmatpush1.bf16.msra.mxu0 %v3423_v37  ;;  %1881 = vmatpush1.bf16.msra.mxu1 %v3426_v41  ;;  %v832_v62 = vmax.f32 %v724_v52, 0.0  ;;  %v728_v63 = vadd.f32 %v727_v58, %v4347_v18  ;;  %v797_v23 = vadd.f32 %v796_v11, %v4361_v30  ;;  %v798_v24 = vpop.f32.mrb[6].mxu1  ;;  %v3441_v41 = vld [vmem:[%s4224_s22 + $0x260] ss:$16 sps:$4 sm:$0xff]   ;;  %v3455_v58 = vld [vmem:[%s4224_s22 + $0x2a4] ss:$16 sps:$4 sm:$0xff]  }
 0x1dc   : > { %1736 = vmatprep.subr.bf16.mxu0 %v3431_v42  ;;  %1882 = vmatprep.subr.bf16.mxu1 %v3434_v46  ;;  %v835_v3 = vmax.f32 %v726_v57, 0.0  ;;  %v833_v29 = vmax.f32 %v795_v10, 0.0  ;;  %v799_v31 = vadd.f32 %v798_v24, %v4356_v28  ;;  %v800_v32 = vpop.f32.mrb[7].mxu1  ;;  %v3444_v42 = vld [vmem:[%s4224_s22 + $0x268] ss:$16 sps:$4 sm:$0xff]  }
 0x1dd   : > { %v836_v5 = vmax.f32 %v728_v63, 0.0  ;;  %v834_v35 = vmax.f32 %v797_v23, 0.0  ;;  %v801_v36 = vadd.f32 %v800_v32, %v4361_v30  ;;  %v3449_v46 = vld [vmem:[%s4224_s22 + $0x284] ss:$16 sps:$4 sm:$0xff]   ;;  %v3447_v53 = vld [vmem:[%s4224_s22 + $0x280] ss:$16 sps:$4 sm:$0xff]  }
 0x1de   : > { %v859_v9 = vpack.c.bf16 %v835_v3, %v831_v56  ;;  %v837_v40 = vmax.f32 %v799_v31, 0.0  ;;  %v3450_v57 = vld [vmem:[%s4224_s22 + $0x288] ss:$16 sps:$4 sm:$0xff]   ;;  %v3458_v63 = vld [vmem:[%s4224_s22 + $0x2ac] ss:$16 sps:$4 sm:$0xff]  }
 0x1df   : > { %1737 = vmatpush1.bf16.msra.mxu0 %v3429_v60  ;;  %1883 = vmatpush1.bf16.msra.mxu1 %v3432_v61  ;;  %v860_v20 = vpack.c.bf16 %v836_v5, %v832_v62  ;;  %v731_v22 = vpop.f32.mrb[8].mxu0  ;;  %v838_v45 = vmax.f32 %v801_v36, 0.0  ;;  %v3456_v23 = vld [vmem:[%s4224_s22 + $0x2a8] ss:$16 sps:$4 sm:$0xff]  }
 0x1e0   : > { %1738 = vmatprep.subr.bf16.mxu0 %v3437_v1  ;;  %1884 = vmatprep.subr.bf16.mxu1 %v3440_v2  ;;  %v732_v26 = vadd.f32 %v731_v22, %v4343_v17  ;;  %v733_v27 = vpop.f32.mrb[9].mxu0  ;;  %v4399_v49 = vpack.c.bf16 %v837_v40, %v833_v29  ;;  %v3453_v22 = vld [vmem:[%s4224_s22 + $0x2a0] ss:$16 sps:$4 sm:$0xff]   ;;  %v3464_v29 = vld [vmem:[%s4224_s22 + $0x2cc] ss:$16 sps:$4 sm:$0xff]  }
 0x1e1   : > { %v734_v33 = vadd.f32 %v733_v27, %v4347_v18  ;;  %v735_v34 = vpop.f32.mrb[10].mxu0  ;;  %1703 = vmatprep.mubr.bf16.mxu0 %v860_v20  ;;  %1849 = vmatprep.mubr.bf16.mxu1 %v860_v20  ;;  %v4401_v51 = vpack.c.bf16 %v838_v45, %v834_v35  ;;  %v804_v52 = vpop.f32.mrb[8].mxu1  ;;  %v3461_v27 = vld [vmem:[%s4224_s22 + $0x2c4] ss:$16 sps:$4 sm:$0xff]  }
 0x1e2   : > { %v839_v37 = vmax.f32 %v732_v26, 0.0  ;;  %v736_v38 = vadd.f32 %v735_v34, %v4343_v17  ;;  %v737_v39 = vpop.f32.mrb[11].mxu0  ;;  %1704 = vmatmul.mubr.bf16.gmra.mrb[20].mxu0 %v859_v9  ;;  %1850 = vmatmul.mubr.bf16.gmra.mrb[20].mxu1 %v859_v9  ;;  %v805_v55 = vadd.f32 %v804_v52, %v4356_v28  ;;  %v806_v56 = vpop.f32.mrb[9].mxu1  ;;  %v3465_v52 = vld [vmem:[%s4224_s22 + $0x2e0] ss:$16 sps:$4 sm:$0xff]  }
 0x1e3   : > { %1739 = vmatpush1.bf16.msra.mxu0 %v3435_v8  ;;  %1885 = vmatpush1.bf16.msra.mxu1 %v3438_v12  ;;  %v840_v43 = vmax.f32 %v734_v33, 0.0  ;;  %v738_v44 = vadd.f32 %v737_v39, %v4347_v18  ;;  %v807_v61 = vadd.f32 %v806_v56, %v4361_v30  ;;  %v808_v62 = vpop.f32.mrb[10].mxu1 }
 0x1e4   : > { %1740 = vmatprep.subr.bf16.mxu0 %v3443_v15  ;;  %1886 = vmatprep.subr.bf16.mxu1 %v3446_v25  ;;  %v843_v48 = vmax.f32 %v736_v38, 0.0  ;;  %v841_v2 = vmax.f32 %v805_v55, 0.0  ;;  %v809_v3 = vadd.f32 %v808_v62, %v4356_v28  ;;  %v810_v5 = vpop.f32.mrb[11].mxu1  ;;  %v3462_v38 = vld [vmem:[%s4224_s22 + $0x2c8] ss:$16 sps:$4 sm:$0xff]  }
 0x1e5   : > { %v844_v50 = vmax.f32 %v738_v44, 0.0  ;;  %v842_v9 = vmax.f32 %v807_v61, 0.0  ;;  %v811_v10 = vadd.f32 %v810_v5, %v4361_v30  ;;  %v3476_v55 = vld [vmem:[%s4224_s22 + $0x30c] ss:$16 sps:$4 sm:$0xff]   ;;  %v3477_v61 = vld [vmem:[%s4224_s22 + $0x320] ss:$16 sps:$4 sm:$0xff]  }
 0x1e6   : > { %v863_v54 = vpack.c.bf16 %v843_v48, %v839_v37  ;;  %v845_v20 = vmax.f32 %v809_v3, 0.0  ;;  %v3459_v37 = vld [vmem:[%s4224_s22 + $0x2c0] ss:$16 sps:$4 sm:$0xff]   ;;  %v3485_v62 = vld [vmem:[%s4224_s22 + $0x344] ss:$16 sps:$4 sm:$0xff]  }
 0x1e7   : > { %1741 = vmatpush1.bf16.msra.mxu0 %v3441_v41  ;;  %1887 = vmatpush1.bf16.msra.mxu1 %v3444_v42  ;;  %v864_v59 = vpack.c.bf16 %v844_v50, %v840_v43  ;;  %v741_v60 = vpop.f32.mrb[12].mxu0  ;;  %v846_v26 = vmax.f32 %v811_v10, 0.0  ;;  %v3467_v42 = vld [vmem:[%s4224_s22 + $0x2e4] ss:$16 sps:$4 sm:$0xff]   ;;  %v3470_v43 = vld [vmem:[%s4224_s22 + $0x2ec] ss:$16 sps:$4 sm:$0xff]  }
 0x1e8   : > { %1742 = vmatprep.subr.bf16.mxu0 %v3449_v46  ;;  %1888 = vmatprep.subr.bf16.mxu1 %v3452_v47  ;;  %v742_v0 = vadd.f32 %v741_v60, %v4343_v17  ;;  %v743_v1 = vpop.f32.mrb[13].mxu0  ;;  %v3482_v60 = vld [vmem:[%s4224_s22 + $0x32c] ss:$16 sps:$4 sm:$0xff]   ;;  %v3489_v5 = vld [vmem:[%s4224_s22 + $0x360] ss:$16 sps:$4 sm:$0xff]  }
 0x1e9   : > { %v744_v7 = vadd.f32 %v743_v1, %v4347_v18  ;;  %v745_v8 = vpop.f32.mrb[14].mxu0  ;;  %1713 = vmatprep.mubr.bf16.mxu0 %v864_v59  ;;  %1859 = vmatprep.mubr.bf16.mxu1 %v864_v59  ;;  %v4421_v33 = vpack.c.bf16 %v846_v26, %v842_v9  ;;  %v814_v34 = vpop.f32.mrb[12].mxu1  ;;  %v3479_v59 = vld [vmem:[%s4224_s22 + $0x324] ss:$16 sps:$4 sm:$0xff]   ;;  %v3486_v1 = vld [vmem:[%s4224_s22 + $0x348] ss:$16 sps:$4 sm:$0xff]  }
 0x1ea   : > { %v847_v11 = vmax.f32 %v742_v0, 0.0  ;;  %v746_v12 = vadd.f32 %v745_v8, %v4343_v17  ;;  %v747_v15 = vpop.f32.mrb[15].mxu0  ;;  %1714 = vmatmul.mubr.bf16.gmra.mrb[24].mxu0 %v863_v54  ;;  %1860 = vmatmul.mubr.bf16.gmra.mrb[24].mxu1 %v863_v54  ;;  %v4419_v17 = vpack.c.bf16 %v845_v20, %v841_v2  ;;  %v815_v36 = vadd.f32 %v814_v34, %v4356_v28  ;;  %v3483_v0 = vld [vmem:[%s4224_s22 + $0x340] ss:$16 sps:$4 sm:$0xff]   ;;  %v3491_v2 = vld [vmem:[%s4224_s22 + $0x364] ss:$16 sps:$4 sm:$0xff]  }
 0x1eb   : > { %1743 = vmatpush1.bf16.msra.mxu0 %v3447_v53  ;;  %1889 = vmatpush1.bf16.msra.mxu1 %v3450_v57  ;;  %v848_v24 = vmax.f32 %v744_v7, 0.0  ;;  %v748_v25 = vadd.f32 %v747_v15, %v4347_v18  ;;  %v816_v18 = vpop.f32.mrb[13].mxu1  ;;  %v3468_v53 = vld [vmem:[%s4224_s22 + $0x2e8] ss:$16 sps:$4 sm:$0xff]   ;;  %v3471_v57 = vld [vmem:[%s4224_s22 + $0x300] ss:$16 sps:$4 sm:$0xff]  }
 0x1ec   : > { %1744 = vmatprep.subr.bf16.mxu0 %v3455_v58  ;;  %1890 = vmatprep.subr.bf16.mxu1 %v3458_v63  ;;  %v851_v31 = vmax.f32 %v746_v12, 0.0  ;;  %v817_v40 = vadd.f32 %v816_v18, %v4361_v30  ;;  %v818_v41 = vpop.f32.mrb[14].mxu1  ;;  %v849_v44 = vmax.f32 %v815_v36, 0.0  ;;  %v3474_v58 = vld [vmem:[%s4224_s22 + $0x308] ss:$16 sps:$4 sm:$0xff]  }
 0x1ed   : > { %v852_v32 = vmax.f32 %v748_v25, 0.0  ;;  %v819_v45 = vadd.f32 %v818_v41, %v4356_v28  ;;  %v820_v46 = vpop.f32.mrb[15].mxu1  ;;  %v3473_v28 = vld [vmem:[%s4224_s22 + $0x304] ss:$16 sps:$4 sm:$0xff]   ;;  %v3488_v63 = vld [vmem:[%s4224_s22 + $0x34c] ss:$16 sps:$4 sm:$0xff]  }
 0x1ee   : > { %v867_v35 = vpack.c.bf16 %v851_v31, %v847_v11  ;;  %v850_v47 = vmax.f32 %v817_v40, 0.0  ;;  %v821_v48 = vadd.f32 %v820_v46, %v4361_v30  ;;  %v3494_v3 = vld [vmem:[%s4224_s22 + $0x36c] ss:$16 sps:$4 sm:$0xff]   ;;  %v3492_v7 = vld [vmem:[%s4224_s22 + $0x368] ss:$16 sps:$4 sm:$0xff]   ;;  %v3526_v40 = vld [vmem:[%s4232_s16 + $0x88] sm:$0xff]  }
 0x1ef   : > { %1745 = vmatpush1.bf16.msra.mxu0 %v3453_v22  ;;  %1891 = vmatpush1.bf16.msra.mxu1 %v3456_v23  ;;  %v868_v39 = vpack.c.bf16 %v852_v32, %v848_v24  ;;  %v853_v50 = vmax.f32 %v819_v45, 0.0  ;;  %v3497_v8 = vld [vmem:[%s4224_s22 + $0x384] ss:$16 sps:$4 sm:$0xff]   ;;  %v3500_v9 = vld [vmem:[%s4224_s22 + $0x38c] ss:$16 sps:$4 sm:$0xff]  }
 0x1f0   : > { %1746 = vmatprep.subr.bf16.mxu0 %v3461_v27  ;;  %1892 = vmatprep.subr.bf16.mxu1 %v3464_v29  ;;  %v854_v54 = vmax.f32 %v821_v48, 0.0  ;;  %v3495_v10 = vld [vmem:[%s4224_s22 + $0x380] ss:$16 sps:$4 sm:$0xff]   ;;  %v3498_v11 = vld [vmem:[%s4224_s22 + $0x388] ss:$16 sps:$4 sm:$0xff]  }
 0x1f1   : > { %1723 = vmatprep.mubr.bf16.mxu0 %v868_v39  ;;  %1869 = vmatprep.mubr.bf16.mxu1 %v868_v39  ;;  %v4435_v56 = vpack.c.bf16 %v853_v50, %v849_v44  ;;  %v3503_v12 = vld [vmem:[%s4224_s22 + $0x3a4] ss:$16 sps:$4 sm:$0xff]   ;;  %v3506_v15 = vld [vmem:[%s4224_s22 + $0x3ac] ss:$16 sps:$4 sm:$0xff]   ;;  %v3501_v20 = vld [vmem:[%s4224_s22 + $0x3a0] ss:$16 sps:$4 sm:$0xff]  }
 0x1f2   : > { %1724 = vmatmul.mubr.bf16.gmra.mrb[28].mxu0 %v867_v35  ;;  %1870 = vmatmul.mubr.bf16.gmra.mrb[28].mxu1 %v867_v35  ;;  %v4439_v30 = vpack.c.bf16 %v854_v54, %v850_v47  ;;  %v3504_v22 = vld [vmem:[%s4224_s22 + $0x3a8] ss:$16 sps:$4 sm:$0xff]   ;;  %v3509_v23 = vld [vmem:[%s4224_s22 + $0x3c4] ss:$16 sps:$4 sm:$0xff]   ;;  %v3512_v24 = vld [vmem:[%s4224_s22 + $0x3cc] ss:$16 sps:$4 sm:$0xff]  }
 0x1f3   : > { %1747 = vmatpush1.bf16.msra.mxu0 %v3459_v37  ;;  %1893 = vmatpush1.bf16.msra.mxu1 %v3462_v38  ;;  %v3507_v25 = vld [vmem:[%s4224_s22 + $0x3c0] ss:$16 sps:$4 sm:$0xff]   ;;  %v3510_v26 = vld [vmem:[%s4224_s22 + $0x3c8] ss:$16 sps:$4 sm:$0xff]   ;;  %v3515_v27 = vld [vmem:[%s4224_s22 + $0x3e4] ss:$16 sps:$4 sm:$0xff]  }
 0x1f4   : > { %1748 = vmatprep.subr.bf16.mxu0 %v3467_v42  ;;  %1894 = vmatprep.subr.bf16.mxu1 %v3470_v43  ;;  %v3518_v29 = vld [vmem:[%s4224_s22 + $0x3ec] ss:$16 sps:$4 sm:$0xff]   ;;  %v3513_v31 = vld [vmem:[%s4224_s22 + $0x3e0] ss:$16 sps:$4 sm:$0xff]   ;;  %v3516_v32 = vld [vmem:[%s4224_s22 + $0x3e8] ss:$16 sps:$4 sm:$0xff]  }
 0x1f5   : > { %1766 = vmatprep.mubr.bf16.mxu0 %v4381_v6  ;;  %1912 = vmatprep.mubr.bf16.mxu1 %v4381_v6  ;;  %v3480_v6 = vld [vmem:[%s4224_s22 + $0x328] ss:$16 sps:$4 sm:$0xff]   ;;  %v3523_v37 = vld [vmem:[%s4232_s16 + $0x48] sm:$0xff]   ;;  %v3532_v44 = vld [vmem:[%s4232_s16 + $0xd8] sm:$0xff]  }
 0x1f6   : > { %v3519_v34 = vld [vmem:[%s4232_s16 + $0x40] sm:$0xff]   ;;  %v3524_v38 = vld [vmem:[%s4232_s16 + $0xc8] sm:$0xff]   ;;  %v3527_v41 = vld [vmem:[%s4232_s16 + $0x50] sm:$0xff]  }
 0x1f7   : > { %1749 = vmatpush1.bf16.msra.mxu0 %v3465_v52  ;;  %1895 = vmatpush1.bf16.msra.mxu1 %v3468_v53  ;;  %v3520_v35 = vld [vmem:[%s4232_s16 + $0xc0] sm:$0xff]   ;;  %v3525_v39 = vld [vmem:[%s4232_s16 + $0x8] sm:$0xff]   ;;  %v3528_v42 = vld [vmem:[%s4232_s16 + $0xd0] sm:$0xff]  }
 0x1f8   : > { %1750 = vmatprep.subr.bf16.mxu0 %v3473_v28  ;;  %1896 = vmatprep.subr.bf16.mxu1 %v3476_v55  ;;  %v3521_v36 = vld [vmem:[%s4232_s16] sm:$0xff]   ;;  %v3529_v43 = vld [vmem:[%s4232_s16 + $0x10] sm:$0xff]   ;;  %v3533_v45 = vld [vmem:[%s4232_s16 + $0x18] sm:$0xff]  }
 0x1f9   : > { %v3522_v18 = vld [vmem:[%s4232_s16 + $0x80] sm:$0xff]   ;;  %v3534_v46 = vld [vmem:[%s4232_s16 + $0x98] sm:$0xff]   ;;  %v3539_v52 = vld [vmem:[%s4232_s16 + $0x68] sm:$0xff]  }
 0x1fa   : > { %v3535_v47 = vld [vmem:[%s4232_s16 + $0x60] sm:$0xff]   ;;  %v3541_v53 = vld [vmem:[%s4232_s16 + $0x28] sm:$0xff]   ;;  %v3544_v28 = vld [vmem:[%s4232_s16 + $0xf0] sm:$0xff]  }
 0x1fb   : > { %1751 = vmatpush1.bf16.msra.mxu0 %v3471_v57  ;;  %1897 = vmatpush1.bf16.msra.mxu1 %v3474_v58  ;;  %v3536_v48 = vld [vmem:[%s4232_s16 + $0xe0] sm:$0xff]   ;;  %v3542_v54 = vld [vmem:[%s4232_s16 + $0xa8] sm:$0xff]   ;;  %v3545_v55 = vld [vmem:[%s4232_s16 + $0x30] sm:$0xff]  }
 0x1fc   : > { %1752 = vmatprep.subr.bf16.mxu0 %v3479_v59  ;;  %1898 = vmatprep.subr.bf16.mxu1 %v3482_v60  ;;  %v3537_v50 = vld [vmem:[%s4232_s16 + $0x20] sm:$0xff]   ;;  %v3547_v57 = vld [vmem:[%s4232_s16 + $0x78] sm:$0xff]  }
 0x1fd   : > { %v3548_v58 = vld [vmem:[%s4232_s16 + $0xf8] sm:$0xff]  }
 0x1fe   : > { %v3549_v59 = vld [vmem:[%s4232_s16 + $0x38] sm:$0xff]  }
 0x1ff   : > { %1753 = vmatpush1.bf16.msra.mxu0 %v3477_v61  ;;  %1899 = vmatpush1.bf16.msra.mxu1 %v3480_v6  ;;  %v3550_v60 = vld [vmem:[%s4232_s16 + $0xb8] sm:$0xff]  }
 0x200   : > { %1754 = vmatprep.subr.bf16.mxu0 %v3485_v62  ;;  %1900 = vmatprep.subr.bf16.mxu1 %v3488_v63  ;;  %v999_v61 = vld [vmem:[%s4226_s21] sm:$0xf] }
 0x201   : > { %v4524_v6 = vrot.slane %v999_v61, %v614_v19  ;;  %v4528_v62 = vrot.slane %v999_v61, %v610_v16  ;;  %v4532_v63 = vrot.slane %v999_v61, %v618_v21 }
 0x203   : > { %1755 = vmatpush1.bf16.msra.mxu0 %v3483_v0  ;;  %1901 = vmatpush1.bf16.msra.mxu1 %v3486_v1 }
 0x204   : > { %1756 = vmatprep.subr.bf16.mxu0 %v3491_v2  ;;  %1902 = vmatprep.subr.bf16.mxu1 %v3494_v3 }
 0x207   : > { %1757 = vmatpush1.bf16.msra.mxu0 %v3489_v5  ;;  %1903 = vmatpush1.bf16.msra.mxu1 %v3492_v7 }
 0x208   : > { %1758 = vmatprep.subr.bf16.mxu0 %v3497_v8  ;;  %1904 = vmatprep.subr.bf16.mxu1 %v3500_v9 }
 0x20b   : > { %1759 = vmatpush1.bf16.msra.mxu0 %v3495_v10  ;;  %1905 = vmatpush1.bf16.msra.mxu1 %v3498_v11 }
 0x20c   : > { %1760 = vmatprep.subr.bf16.mxu0 %v3503_v12  ;;  %1906 = vmatprep.subr.bf16.mxu1 %v3506_v15 }
 0x20f   : > { %1761 = vmatpush1.bf16.msra.mxu0 %v3501_v20  ;;  %1907 = vmatpush1.bf16.msra.mxu1 %v3504_v22 }
 0x210   : > { %1762 = vmatprep.subr.bf16.mxu0 %v3509_v23  ;;  %1908 = vmatprep.subr.bf16.mxu1 %v3512_v24 }
 0x213   : > { %1763 = vmatpush1.bf16.msra.mxu0 %v3507_v25  ;;  %1909 = vmatpush1.bf16.msra.mxu1 %v3510_v26 }
 0x214   : > { %1764 = vmatprep.subr.bf16.mxu0 %v3515_v27  ;;  %1910 = vmatprep.subr.bf16.mxu1 %v3518_v29 }
 0x217   : > { %1765 = vmatpush1.bf16.msra.mxu0 %v3513_v31  ;;  %1911 = vmatpush1.bf16.msra.mxu1 %v3516_v32 }
 0x218   : > { %3019 = vmatprep.subr.bf16.mxu0 %v3519_v34  ;;  %3059 = vmatprep.subr.bf16.mxu1 %v3520_v35 }
 0x21a   : > { %1767 = vmatmul.mubr.bf16.vlgmr.msra.gmra.mrb[16].mxu0 %v4379_v4  ;;  %1913 = vmatmul.mubr.bf16.vlgmr.msra.gmra.mrb[16].mxu1 %v4379_v4  ;;  %v3530_v4 = vld [vmem:[%s4232_s16 + $0x90] sm:$0xff]  }
 0x21b   : > { %1776 = vmatprep.mubr.bf16.mxu0 %v4401_v51  ;;  %1922 = vmatprep.mubr.bf16.mxu1 %v4401_v51  ;;  %v3531_v51 = vld [vmem:[%s4232_s16 + $0x58] sm:$0xff]  }
 0x21c   : > { %3020 = vmatpush3.bf16.msra.mxu0 %v3521_v36  ;;  %3060 = vmatpush3.bf16.msra.mxu1 %v3522_v18 }
 0x21d   : > { %3021 = vmatprep.subr.bf16.mxu0 %v3523_v37  ;;  %3061 = vmatprep.subr.bf16.mxu1 %v3524_v38 }
 0x220   : > { %3022 = vmatpush3.bf16.msra.mxu0 %v3525_v39  ;;  %3062 = vmatpush3.bf16.msra.mxu1 %v3526_v40 }
 0x221   : > { %3023 = vmatprep.subr.bf16.mxu0 %v3527_v41  ;;  %3063 = vmatprep.subr.bf16.mxu1 %v3528_v42 }
 0x222   : > { %1777 = vmatmul.mubr.bf16.gmra.mrb[20].mxu0 %v4399_v49  ;;  %1923 = vmatmul.mubr.bf16.gmra.mrb[20].mxu1 %v4399_v49  ;;  %v3538_v49 = vld [vmem:[%s4232_s16 + $0xa0] sm:$0xff]  }
 0x223   : > { %1786 = vmatprep.mubr.bf16.mxu0 %v4421_v33  ;;  %1932 = vmatprep.mubr.bf16.mxu1 %v4421_v33  ;;  %v3540_v33 = vld [vmem:[%s4232_s16 + $0xe8] sm:$0xff]  }
 0x224   : > { %3024 = vmatpush3.bf16.msra.mxu0 %v3529_v43  ;;  %3064 = vmatpush3.bf16.msra.mxu1 %v3530_v4 }
 0x225   : > { %3025 = vmatprep.subr.bf16.mxu0 %v3531_v51  ;;  %3065 = vmatprep.subr.bf16.mxu1 %v3532_v44 }
 0x228   : > { %3026 = vmatpush3.bf16.msra.mxu0 %v3533_v45  ;;  %3066 = vmatpush3.bf16.msra.mxu1 %v3534_v46 }
 0x229   : > { %3027 = vmatprep.subr.bf16.mxu0 %v3535_v47  ;;  %3067 = vmatprep.subr.bf16.mxu1 %v3536_v48 }
 0x22a   : > { %1787 = vmatmul.mubr.bf16.gmra.mrb[24].mxu0 %v4419_v17  ;;  %1933 = vmatmul.mubr.bf16.gmra.mrb[24].mxu1 %v4419_v17  ;;  %v3543_v17 = vld [vmem:[%s4232_s16 + $0x70] sm:$0xff]  }
 0x22b   : > { %1796 = vmatprep.mubr.bf16.mxu0 %v4439_v30  ;;  %1942 = vmatprep.mubr.bf16.mxu1 %v4439_v30  ;;  %v3546_v30 = vld [vmem:[%s4232_s16 + $0xb0] sm:$0xff]  }
 0x22c   : > { %3028 = vmatpush3.bf16.msra.mxu0 %v3537_v50  ;;  %3068 = vmatpush3.bf16.msra.mxu1 %v3538_v49 }
 0x22d   : > { %3029 = vmatprep.subr.bf16.mxu0 %v3539_v52  ;;  %3069 = vmatprep.subr.bf16.mxu1 %v3540_v33 }
 0x230   : > { %3030 = vmatpush3.bf16.msra.mxu0 %v3541_v53  ;;  %3070 = vmatpush3.bf16.msra.mxu1 %v3542_v54 }
 0x231   : > { %3031 = vmatprep.subr.bf16.mxu0 %v3543_v17  ;;  %3071 = vmatprep.subr.bf16.mxu1 %v3544_v28 }
 0x232   : > { %1797 = vmatmul.mubr.bf16.gmra.mrb[28].mxu0 %v4435_v56  ;;  %1943 = vmatmul.mubr.bf16.gmra.mrb[28].mxu1 %v4435_v56  ;;  %v4520_v56 = vrot.slane %v999_v61, %v606_v14 }
 0x234   : > { %3032 = vmatpush3.bf16.msra.mxu0 %v3545_v55  ;;  %3072 = vmatpush3.bf16.msra.mxu1 %v3546_v30 }
 0x235   : > { %3033 = vmatprep.subr.bf16.mxu0 %v3547_v57  ;;  %3073 = vmatprep.subr.bf16.mxu1 %v3548_v58 }
 0x238   : > { %3034 = vmatpush3.bf16.msra.mxu0 %v3549_v59  ;;  %3074 = vmatpush3.bf16.msra.mxu1 %v3550_v60 }
 0x2ed   : > { %v1768_v0 = vpop.f32.mrb[16].mxu0  ;;  %v1914_v1 = vpop.f32.mrb[16].mxu1 }
 0x2ee   : > { %v3135_v2 = vadd.f32 %v1768_v0, %v4520_v56  ;;  %v3151_v3 = vadd.f32 %v1914_v1, %v4524_v6  ;;  %v1770_v14 = vpop.f32.mrb[17].mxu0  ;;  %v1916_v5 = vpop.f32.mrb[17].mxu1 }
 0x2ef   : > { %v3136_v7 = vadd.f32 %v1770_v14, %v4528_v62  ;;  %v3152_v19 = vadd.f32 %v1916_v5, %v4532_v63  ;;  %v1772_v8 = vpop.f32.mrb[18].mxu0  ;;  %v1918_v9 = vpop.f32.mrb[18].mxu1 }
 0x2f0   : > { %v3137_v16 = vadd.f32 %v1772_v8, %v4520_v56  ;;  %v3153_v13 = vadd.f32 %v1918_v9, %v4524_v6  ;;  %v1774_v21 = vpop.f32.mrb[19].mxu0  ;;  %v1920_v10 = vpop.f32.mrb[19].mxu1  ;;  %v1953_v15 = vmax.f32 %v3135_v2, 0.0  ;;  %v1955_v20 = vmax.f32 %v3151_v3, 0.0 }
 0x2f1   : > { %v3138_v11 = vadd.f32 %v1774_v21, %v4528_v62  ;;  %v3154_v12 = vadd.f32 %v1920_v10, %v4532_v63  ;;  %v1954_v24 = vmax.f32 %v3136_v7, 0.0  ;;  %v1956_v25 = vmax.f32 %v3152_v19, 0.0 }
 0x2f2   : > { %v1957_v22 = vmax.f32 %v3137_v16, 0.0  ;;  %v1959_v23 = vmax.f32 %v3153_v13, 0.0 }
 0x2f3   : > { %v1958_v26 = vmax.f32 %v3138_v11, 0.0  ;;  %v1960_v27 = vmax.f32 %v3154_v12, 0.0 }
 0x2f4   : > { %v1993_v29 = vpack.c.bf16 %v1957_v22, %v1953_v15  ;;  %v1995_v31 = vpack.c.bf16 %v1959_v23, %v1955_v20 }
 0x2f5   : > { %v1994_v32 = vpack.c.bf16 %v1958_v26, %v1954_v24  ;;  %v1996_v34 = vpack.c.bf16 %v1960_v27, %v1956_v25  ;;  %v1778_v35 = vpop.f32.mrb[20].mxu0  ;;  %v1924_v36 = vpop.f32.mrb[20].mxu1 }
 0x2f6   : > { %v3139_v18 = vadd.f32 %v1778_v35, %v4520_v56  ;;  %v3155_v37 = vadd.f32 %v1924_v36, %v4524_v6  ;;  %v1780_v38 = vpop.f32.mrb[21].mxu0  ;;  %v1926_v39 = vpop.f32.mrb[21].mxu1 }
 0x2f7   : > { %v3140_v40 = vadd.f32 %v1780_v38, %v4528_v62  ;;  %v3156_v41 = vadd.f32 %v1926_v39, %v4532_v63  ;;  %v1782_v42 = vpop.f32.mrb[22].mxu0  ;;  %v1928_v43 = vpop.f32.mrb[22].mxu1  ;;  %2297 = vmatprep.mubr.bf16.mxu0 %v1994_v32  ;;  %2362 = vmatprep.mubr.bf16.mxu1 %v1996_v34 }
 0x2f8   : > { %v3141_v4 = vadd.f32 %v1782_v42, %v4520_v56  ;;  %v3157_v51 = vadd.f32 %v1928_v43, %v4524_v6  ;;  %v1784_v44 = vpop.f32.mrb[23].mxu0  ;;  %v1930_v45 = vpop.f32.mrb[23].mxu1  ;;  %2298 = vmatmul.mubr.bf16.vlgmr.msra.gmra.mrb[32].mxu0 %v1993_v29  ;;  %2363 = vmatmul.mubr.bf16.vlgmr.msra.gmra.mrb[32].mxu1 %v1995_v31  ;;  %v1961_v48 = vmax.f32 %v3139_v18, 0.0  ;;  %v1963_v50 = vmax.f32 %v3155_v37, 0.0 }
 0x2f9   : > { %v3142_v46 = vadd.f32 %v1784_v44, %v4528_v62  ;;  %v3158_v47 = vadd.f32 %v1930_v45, %v4532_v63  ;;  %v1962_v33 = vmax.f32 %v3140_v40, 0.0  ;;  %v1964_v53 = vmax.f32 %v3156_v41, 0.0 }
 0x2fa   : > { %v1965_v49 = vmax.f32 %v3141_v4, 0.0  ;;  %v1967_v52 = vmax.f32 %v3157_v51, 0.0 }
 0x2fb   : > { %v1966_v54 = vmax.f32 %v3142_v46, 0.0  ;;  %v1968_v17 = vmax.f32 %v3158_v47, 0.0 }
 0x2fc   : > { %v1997_v28 = vpack.c.bf16 %v1965_v49, %v1961_v48  ;;  %v1999_v55 = vpack.c.bf16 %v1967_v52, %v1963_v50 }
 0x2fd   : > { %v1998_v30 = vpack.c.bf16 %v1966_v54, %v1962_v33  ;;  %v2000_v57 = vpack.c.bf16 %v1968_v17, %v1964_v53  ;;  %v1788_v58 = vpop.f32.mrb[24].mxu0  ;;  %v1934_v59 = vpop.f32.mrb[24].mxu1 }
 0x2fe   : > { %v3143_v60 = vadd.f32 %v1788_v58, %v4520_v56  ;;  %v3159_v61 = vadd.f32 %v1934_v59, %v4524_v6  ;;  %v1790_v0 = vpop.f32.mrb[25].mxu0  ;;  %v1936_v1 = vpop.f32.mrb[25].mxu1  ;;  %v1985_v58 = vld [vmem:[#allocation2] sm:$0xff] }
 0x2ff   : > { %v3144_v2 = vadd.f32 %v1790_v0, %v4528_v62  ;;  %v3160_v3 = vadd.f32 %v1936_v1, %v4532_v63  ;;  %v1792_v14 = vpop.f32.mrb[26].mxu0  ;;  %v1938_v5 = vpop.f32.mrb[26].mxu1  ;;  %2305 = vmatprep.mubr.bf16.mxu0 %v1998_v30  ;;  %2370 = vmatprep.mubr.bf16.mxu1 %v2000_v57 }
 0x300   : > { %v3145_v7 = vadd.f32 %v1792_v14, %v4520_v56  ;;  %v3161_v19 = vadd.f32 %v1938_v5, %v4524_v6  ;;  %v1794_v8 = vpop.f32.mrb[27].mxu0  ;;  %v1940_v9 = vpop.f32.mrb[27].mxu1  ;;  %2306 = vmatmul.mubr.bf16.gmra.mrb[36].mxu0 %v1997_v28  ;;  %2371 = vmatmul.mubr.bf16.gmra.mrb[36].mxu1 %v1999_v55  ;;  %v1969_v21 = vmax.f32 %v3143_v60, 0.0  ;;  %v1971_v10 = vmax.f32 %v3159_v61, 0.0 }
 0x301   : > { %v3146_v16 = vadd.f32 %v1794_v8, %v4528_v62  ;;  %v3162_v13 = vadd.f32 %v1940_v9, %v4532_v63  ;;  %v1970_v15 = vmax.f32 %v3144_v2, 0.0  ;;  %v1972_v20 = vmax.f32 %v3160_v3, 0.0  ;;  %v1986_v2 = vld [vmem:[#allocation2 + $0x8] sm:$0xff] }
 0x302   : > { %v1973_v11 = vmax.f32 %v3145_v7, 0.0  ;;  %v1975_v12 = vmax.f32 %v3161_v19, 0.0 }
 0x303   : > { %v1974_v22 = vmax.f32 %v3146_v16, 0.0  ;;  %v1976_v23 = vmax.f32 %v3162_v13, 0.0 }
 0x304   : > { %v2001_v24 = vpack.c.bf16 %v1973_v11, %v1969_v21  ;;  %v2003_v25 = vpack.c.bf16 %v1975_v12, %v1971_v10  ;;  %v1987_v11 = vld [vmem:[#allocation2 + $0x10] sm:$0xff] }
 0x305   : > { %v2002_v26 = vpack.c.bf16 %v1974_v22, %v1970_v15  ;;  %v2004_v27 = vpack.c.bf16 %v1976_v23, %v1972_v20  ;;  %v1798_v29 = vpop.f32.mrb[28].mxu0  ;;  %v1944_v31 = vpop.f32.mrb[28].mxu1 }
 0x306   : > { %v3147_v32 = vadd.f32 %v1798_v29, %v4520_v56  ;;  %v3163_v34 = vadd.f32 %v1944_v31, %v4524_v6  ;;  %v1800_v35 = vpop.f32.mrb[29].mxu0  ;;  %v1946_v36 = vpop.f32.mrb[29].mxu1 }
 0x307   : > { %v3148_v18 = vadd.f32 %v1800_v35, %v4528_v62  ;;  %v3164_v37 = vadd.f32 %v1946_v36, %v4532_v63  ;;  %v1802_v38 = vpop.f32.mrb[30].mxu0  ;;  %v1948_v39 = vpop.f32.mrb[30].mxu1  ;;  %2313 = vmatprep.mubr.bf16.mxu0 %v2002_v26  ;;  %2378 = vmatprep.mubr.bf16.mxu1 %v2004_v27 }
 0x308   : > { %v3149_v40 = vadd.f32 %v1802_v38, %v4520_v56  ;;  %v3165_v41 = vadd.f32 %v1948_v39, %v4524_v6  ;;  %v1804_v42 = vpop.f32.mrb[31].mxu0  ;;  %v1950_v43 = vpop.f32.mrb[31].mxu1  ;;  %2314 = vmatmul.mubr.bf16.gmra.mrb[40].mxu0 %v2001_v24  ;;  %2379 = vmatmul.mubr.bf16.gmra.mrb[40].mxu1 %v2003_v25  ;;  %v1977_v44 = vmax.f32 %v3147_v32, 0.0  ;;  %v1979_v45 = vmax.f32 %v3163_v34, 0.0  ;;  %v1988_v24 = vld [vmem:[#allocation2 + $0x18] sm:$0xff]  ;;  %v1989_v38 = vld [vmem:[#allocation2 + $0x20] sm:$0xff] }
 0x309   : > { %v3150_v4 = vadd.f32 %v1804_v42, %v4528_v62  ;;  %v3166_v51 = vadd.f32 %v1950_v43, %v4532_v63  ;;  %v1978_v48 = vmax.f32 %v3148_v18, 0.0  ;;  %v1980_v50 = vmax.f32 %v3164_v37, 0.0 }
 0x30a   : > { %v1981_v46 = vmax.f32 %v3149_v40, 0.0  ;;  %v1983_v47 = vmax.f32 %v3165_v41, 0.0 }
 0x30b   : > { %v1982_v49 = vmax.f32 %v3150_v4, 0.0  ;;  %v1984_v52 = vmax.f32 %v3166_v51, 0.0  ;;  %v1990_v4 = vld [vmem:[#allocation2 + $0x28] sm:$0xff] }
 0x30c   : > { %v2005_v33 = vpack.c.bf16 %v1981_v46, %v1977_v44  ;;  %v2007_v56 = vpack.c.bf16 %v1983_v47, %v1979_v45 }
 0x30d   : > { %v2006_v53 = vpack.c.bf16 %v1982_v49, %v1978_v48  ;;  %v2008_v6 = vpack.c.bf16 %v1984_v52, %v1980_v50 }
 0x30f   : > { %2321 = vmatprep.mubr.bf16.mxu0 %v2006_v53  ;;  %2386 = vmatprep.mubr.bf16.mxu1 %v2008_v6  ;;  %v1991_v53 = vld [vmem:[#allocation2 + $0x30] sm:$0xff] }
 0x310   : > { %2322 = vmatmul.mubr.bf16.gmra.mrb[44].mxu0 %v2005_v33  ;;  %2387 = vmatmul.mubr.bf16.gmra.mrb[44].mxu1 %v2007_v56 }
 0x3cb   : > { %v3035_v54 = vpop.f32.mrb[32].mxu0  ;;  %v3075_v62 = vpop.f32.mrb[32].mxu1 }
 0x3cc   : > { %v3036_v17 = vpop.f32.mrb[33].mxu0  ;;  %v3076_v63 = vpop.f32.mrb[33].mxu1 }
 0x3cd   : > { %v3037_v28 = vadd.f32 %v3036_v17, %v3035_v54  ;;  %v3077_v55 = vadd.f32 %v3076_v63, %v3075_v62  ;;  %v3038_v30 = vpop.f32.mrb[34].mxu0  ;;  %v3078_v57 = vpop.f32.mrb[34].mxu1 }
 0x3ce   : > { %v3039_v59 = vpop.f32.mrb[35].mxu0  ;;  %v3079_v60 = vpop.f32.mrb[35].mxu1 }
 0x3cf   : > { %v2365_v61 = vadd.f32 %v3077_v55, %v3037_v28  ;;  %v3040_v0 = vadd.f32 %v3039_v59, %v3038_v30  ;;  %v3080_v1 = vadd.f32 %v3079_v60, %v3078_v57  ;;  %v1992_v28 = vld [vmem:[#allocation2 + $0x38] sm:$0xff]  ;;  %v3552_v59 = vld [vmem:[%s4703_s20 + $0x8] sm:$0xff] (!%p2998_p6)   ;;  %v3553_v60 = vld [vmem:[%s4703_s20 + $0x10] sm:$0xff] (!%p2998_p6)  }
 0x3d1   : > { %v2395_v3 = vadd.f32 %v2365_v61, %v1985_v58  ;;  %v2368_v14 = vadd.f32 %v3080_v1, %v3040_v0  ;;  %v3551_v58 = vld [vmem:[%s4703_s20] sm:$0xff] (!%p2998_p6)   ;;  %v3554_v61 = vld [vmem:[%s4703_s20 + $0x18] sm:$0xff] (!%p2998_p6)  }
 0x3d2   : > { %3111 = vmatprep.subr.bf16.mxu0 (!%p2998_p6), %v3551_v58  ;;  %3199 = vmatprep.subr.bf16.mxu1 (!%p2998_p6), %v3551_v58 }
 0x3d3   : > { %2403 = vst [vmem:[#allocation2] sm:$0xff] %v2395_v3  ;;  %v2396_v5 = vadd.f32 %v2368_v14, %v1986_v2  ;;  %v3041_v7 = vpop.f32.mrb[36].mxu0  ;;  %v3081_v19 = vpop.f32.mrb[36].mxu1  ;;  %3112 = vmatpush3.bf16.msra.mxu0 (!%p2998_p6), %v3551_v58  ;;  %3207 = vmatpush3.bf16.msra.mxu1 (!%p2998_p6), %v3551_v58  ;;  %v2999_v2 = vld [vmem:[#allocation11] ss:$0 sm:$0xff] (!%p2998_p6) }
 0x3d4   : > { %v3042_v8 = vpop.f32.mrb[37].mxu0  ;;  %v3082_v9 = vpop.f32.mrb[37].mxu1  ;;  %3113 = vmatprep.subr.bf16.mxu0 (!%p2998_p6), %v3552_v59  ;;  %3200 = vmatprep.subr.bf16.mxu1 (!%p2998_p6), %v3552_v59 }
 0x3d5   : > { %2404 = vst [vmem:[#allocation2 + $0x8] sm:$0xff] %v2396_v5  ;;  %v3043_v16 = vadd.f32 %v3042_v8, %v3041_v7  ;;  %v3083_v13 = vadd.f32 %v3082_v9, %v3081_v19  ;;  %v3044_v21 = vpop.f32.mrb[38].mxu0  ;;  %v3084_v10 = vpop.f32.mrb[38].mxu1 }
 0x3d6   : > { %v3045_v12 = vpop.f32.mrb[39].mxu0  ;;  %v3085_v15 = vpop.f32.mrb[39].mxu1 }
 0x3d7   : > { %v2373_v20 = vadd.f32 %v3083_v13, %v3043_v16  ;;  %v3046_v22 = vadd.f32 %v3045_v12, %v3044_v21  ;;  %v3086_v23 = vadd.f32 %v3085_v15, %v3084_v10  ;;  %3114 = vmatpush3.bf16.msra.mxu0 (!%p2998_p6), %v3552_v59  ;;  %3208 = vmatpush3.bf16.msra.mxu1 (!%p2998_p6), %v3552_v59  ;;  %v3555_v13 = vld [vmem:[%s4703_s20 + $0x20] sm:$0xff] (!%p2998_p6)   ;;  %v3556_v15 = vld [vmem:[%s4703_s20 + $0x28] sm:$0xff] (!%p2998_p6)  }
 0x3d8   : > { %3115 = vmatprep.subr.bf16.mxu0 (!%p2998_p6), %v3553_v60  ;;  %3201 = vmatprep.subr.bf16.mxu1 (!%p2998_p6), %v3553_v60 }
 0x3d9   : > { %v2397_v25 = vadd.f32 %v2373_v20, %v1987_v11  ;;  %v2376_v26 = vadd.f32 %v3086_v23, %v3046_v22 }
 0x3da   : > { %v2415_v0 = vld [vmem:[#allocation2] sm:$0xff] (!%p2998_p6) }
 0x3db   : > { %2405 = vst [vmem:[#allocation2 + $0x10] sm:$0xff] %v2397_v25  ;;  %v2398_v27 = vadd.f32 %v2376_v26, %v1988_v24  ;;  %v3047_v29 = vpop.f32.mrb[40].mxu0  ;;  %v3087_v31 = vpop.f32.mrb[40].mxu1  ;;  %v2430_v3 = vadd.f32 (!%p2998_p6), %v2999_v2, %v2415_v0  ;;  %3116 = vmatpush3.bf16.msra.mxu0 (!%p2998_p6), %v3553_v60  ;;  %3209 = vmatpush3.bf16.msra.mxu1 (!%p2998_p6), %v3553_v60  ;;  %v3557_v25 = vld [vmem:[%s4703_s20 + $0x30] sm:$0xff] (!%p2998_p6)  }
 0x3dc   : > { %v3048_v32 = vpop.f32.mrb[41].mxu0  ;;  %v3088_v34 = vpop.f32.mrb[41].mxu1  ;;  %v2416_v1 = vld [vmem:[#allocation2 + $0x8] sm:$0xff] (!%p2998_p6)  ;;  %3117 = vmatprep.subr.bf16.mxu0 (!%p2998_p6), %v3554_v61  ;;  %3202 = vmatprep.subr.bf16.mxu1 (!%p2998_p6), %v3554_v61 }
 0x3dd   : > { %2406 = vst [vmem:[#allocation2 + $0x18] sm:$0xff] %v2398_v27  ;;  %v3049_v35 = vadd.f32 %v3048_v32, %v3047_v29  ;;  %v3089_v36 = vadd.f32 %v3088_v34, %v3087_v31  ;;  %v3050_v18 = vpop.f32.mrb[42].mxu0  ;;  %v3090_v37 = vpop.f32.mrb[42].mxu1  ;;  %v2431_v14 = vadd.f32 (!%p2998_p6), %v2999_v2, %v2416_v1  ;;  %v2438_v9 = vmax.f32 (!%p2998_p6), %v2430_v3, 0.0  ;;  %v3558_v32 = vld [vmem:[%s4703_s20 + $0x38] sm:$0xff] (!%p2998_p6)  }
 0x3de   : > { %v3051_v39 = vpop.f32.mrb[43].mxu0  ;;  %v3091_v40 = vpop.f32.mrb[43].mxu1 }
 0x3df   : > { %v2381_v41 = vadd.f32 %v3089_v36, %v3049_v35  ;;  %v3052_v42 = vadd.f32 %v3051_v39, %v3050_v18  ;;  %v3092_v43 = vadd.f32 %v3091_v40, %v3090_v37  ;;  %v2439_v16 = vmax.f32 (!%p2998_p6), %v2431_v14, 0.0  ;;  %3118 = vmatpush3.bf16.msra.mxu0 (!%p2998_p6), %v3554_v61  ;;  %3210 = vmatpush3.bf16.msra.mxu1 (!%p2998_p6), %v3554_v61  ;;  %v3000_v39 = vld [vmem:[#allocation13] ss:$0 sm:$0xff] (!%p2998_p6) }
 0x3e0   : > { %3119 = vmatprep.subr.bf16.mxu0 (!%p2998_p6), %v3555_v13  ;;  %3203 = vmatprep.subr.bf16.mxu1 (!%p2998_p6), %v3555_v13 }
 0x3e1   : > { %v2399_v51 = vadd.f32 %v2381_v41, %v1989_v38  ;;  %v2384_v44 = vadd.f32 %v3092_v43, %v3052_v42  ;;  %v2446_v11 = vpack.c.bf16 (!%p2998_p6), %v2439_v16, %v2438_v9 }
 0x3e2   : > { %v2417_v20 = vld [vmem:[#allocation2 + $0x10] sm:$0xff] (!%p2998_p6) }
 0x3e3   : > { %2407 = vst [vmem:[#allocation2 + $0x20] sm:$0xff] %v2399_v51  ;;  %v2400_v45 = vadd.f32 %v2384_v44, %v1990_v4  ;;  %v3053_v46 = vpop.f32.mrb[44].mxu0  ;;  %v3093_v47 = vpop.f32.mrb[44].mxu1  ;;  %3127 = vmatprep.mubr.bf16.mxu0 (!%p2998_p6), %v2446_v11  ;;  %3120 = vmatpush3.bf16.msra.mxu0 (!%p2998_p6), %v3555_v13  ;;  %v2432_v26 = vadd.f32 (!%p2998_p6), %v2999_v2, %v2417_v20 }
 0x3e4   : > { %v3054_v48 = vpop.f32.mrb[45].mxu0  ;;  %v3094_v50 = vpop.f32.mrb[45].mxu1  ;;  %3211 = vmatpush3.bf16.msra.mxu1 (!%p2998_p6), %v3555_v13  ;;  %v2418_v22 = vld [vmem:[#allocation2 + $0x18] sm:$0xff] (!%p2998_p6)  ;;  %3121 = vmatprep.subr.bf16.mxu0 (!%p2998_p6), %v3556_v15 }
 0x3e5   : > { %2408 = vst [vmem:[#allocation2 + $0x28] sm:$0xff] %v2400_v45  ;;  %v3055_v49 = vadd.f32 %v3054_v48, %v3053_v46  ;;  %v3095_v52 = vadd.f32 %v3094_v50, %v3093_v47  ;;  %v3056_v33 = vpop.f32.mrb[46].mxu0  ;;  %v3096_v56 = vpop.f32.mrb[46].mxu1  ;;  %3204 = vmatprep.subr.bf16.mxu1 (!%p2998_p6), %v3556_v15  ;;  %v2433_v27 = vadd.f32 (!%p2998_p6), %v2999_v2, %v2418_v22  ;;  %v2440_v34 = vmax.f32 (!%p2998_p6), %v2432_v26, 0.0 }
 0x3e6   : > { %v3057_v6 = vpop.f32.mrb[47].mxu0  ;;  %v3097_v54 = vpop.f32.mrb[47].mxu1 }
 0x3e7   : > { %v2389_v62 = vadd.f32 %v3095_v52, %v3055_v49  ;;  %v3058_v17 = vadd.f32 %v3057_v6, %v3056_v33  ;;  %v3098_v63 = vadd.f32 %v3097_v54, %v3096_v56  ;;  %2414 = sbr.rel (%p2998_p6) target bundleno = 1237 (0x4d5), region = 92  ;;  %3122 = vmatpush3.bf16.msra.mxu0 (!%p2998_p6), %v3556_v15  ;;  %v2441_v35 = vmax.f32 (!%p2998_p6), %v2433_v27, 0.0 }
 0x3e8   : > { %3212 = vmatpush3.bf16.msra.mxu1 (!%p2998_p6), %v3556_v15  ;;  %3123 = vmatprep.subr.bf16.mxu0 (!%p2998_p6), %v3557_v25 }
 0x3e9   : > { %v2401_v55 = vadd.f32 %v2389_v62, %v1991_v53  ;;  %v2392_v30 = vadd.f32 %v3098_v63, %v3058_v17  ;;  %3205 = vmatprep.subr.bf16.mxu1 (!%p2998_p6), %v3557_v25  ;;  %v2447_v37 = vpack.c.bf16 (!%p2998_p6), %v2441_v35, %v2440_v34 }
 0x3ea   : > { %v2419_v5 = vld [vmem:[#allocation2 + $0x20] sm:$0xff] (!%p2998_p6) }
 0x3eb   : > { %2409 = vst [vmem:[#allocation2 + $0x30] sm:$0xff] %v2401_v55  ;;  %v2402_v57 = vadd.f32 %v2392_v30, %v1992_v28  ;;  %v2434_v19 = vadd.f32 (!%p2998_p6), %v2999_v2, %v2419_v5  ;;  %3124 = vmatpush3.bf16.msra.mxu0 (!%p2998_p6), %v3557_v25 }
 0x3ec   : > { %v2420_v7 = vld [vmem:[#allocation2 + $0x28] sm:$0xff] (!%p2998_p6)  ;;  %3213 = vmatpush3.bf16.msra.mxu1 (!%p2998_p6), %v3557_v25  ;;  %3125 = vmatprep.subr.bf16.mxu0 (!%p2998_p6), %v3558_v32 }
 0x3ed   : > { %2410 = vst [vmem:[#allocation2 + $0x38] sm:$0xff] %v2402_v57  ;;  %v2435_v8 = vadd.f32 (!%p2998_p6), %v2999_v2, %v2420_v7  ;;  %v2442_v21 = vmax.f32 (!%p2998_p6), %v2434_v19, 0.0  ;;  %3206 = vmatprep.subr.bf16.mxu1 (!%p2998_p6), %v3558_v32 }
 0x3ef   : > { %v2443_v10 = vmax.f32 %v2435_v8, 0.0  ;;  %3126 = vmatpush3.bf16.msra.mxu0 %v3558_v32 }
 0x3f0   : > { %3214 = vmatpush3.bf16.msra.mxu1 %v3558_v32 }
 0x3f1   : > { %v2448_v12 = vpack.c.bf16 %v2443_v10, %v2442_v21 }
 0x3f2   : > { %v2421_v23 = vld [vmem:[#allocation2 + $0x30] sm:$0xff]  ;;  %3128 = vmatmul.mubr.bf16.vlgmr.msra.gmra.mrb[0].mxu0 %v2447_v37 }
 0x3f3   : > { %3131 = vmatprep.mubr.bf16.mxu1 %v2448_v12  ;;  %v2436_v29 = vadd.f32 %v2999_v2, %v2421_v23 }
 0x3f4   : > { %v2422_v24 = vld [vmem:[#allocation2 + $0x38] sm:$0xff] }
 0x3f5   : > { %v2437_v31 = vadd.f32 %v2999_v2, %v2422_v24  ;;  %v2444_v36 = vmax.f32 %v2436_v29, 0.0 }
 0x3f7   : > { %v2445_v18 = vmax.f32 %v2437_v31, 0.0 }
 0x3f9   : > { %v2449_v38 = vpack.c.bf16 %v2445_v18, %v2444_v36 }
 0x3fb   : > { %3132 = vmatmul.mubr.bf16.vlgmr.msra.gmra.mrb[0].mxu1 %v2449_v38 }
 0x4c5   : > { %v3129_v40 = vpop.f32.mrb[0].mxu0 }
 0x4c6   : > { %v2564_v42 = vadd.f32 %v3129_v40, %v3000_v39  ;;  %v2555_v4 = vpop.f32.mrb[1].mxu0 }
 0x4c7   : > { %v2556_v44 = vadd.f32 %v3000_v39, %v2555_v4  ;;  %v3130_v46 = vpop.f32.mrb[2].mxu0 }
 0x4c8   : > { %2589 = vst.msk [vmem:[%s4704_s6 + $0x10] sm:$0xff] %vm2586_vm1, %v2564_v42  ;;  %v2567_v48 = vadd.f32 %v3130_v46, %v3000_v39  ;;  %v2558_v49 = vpop.f32.mrb[3].mxu0 }
 0x4c9   : > { %2587 = vst.msk [vmem:[%s4704_s6] sm:$0xff] %vm2586_vm1, %v2556_v44  ;;  %v2559_v33 = vadd.f32 %v3000_v39, %v2558_v49 }
 0x4ca   : > { %2590 = vst.msk [vmem:[%s4704_s6 + $0x18] sm:$0xff] %vm2586_vm1, %v2567_v48 }
 0x4cb   : > { %2588 = vst.msk [vmem:[%s4704_s6 + $0x8] sm:$0xff] %vm2586_vm1, %v2559_v33 }
 0x4ce   : > { %v3133_v41 = vpop.f32.mrb[0].mxu1 }
 0x4cf   : > { %v2580_v43 = vadd.f32 %v3133_v41, %v3000_v39  ;;  %v2571_v51 = vpop.f32.mrb[1].mxu1 }
 0x4d0   : > { %v2572_v45 = vadd.f32 %v3000_v39, %v2571_v51  ;;  %v3134_v47 = vpop.f32.mrb[2].mxu1 }
 0x4d1   : > { %2593 = vst.msk [vmem:[%s4704_s6 + $0x30] sm:$0xff] %vm2586_vm1, %v2580_v43  ;;  %v2583_v50 = vadd.f32 %v3134_v47, %v3000_v39  ;;  %v2574_v52 = vpop.f32.mrb[3].mxu1 }
 0x4d2   : > { %2591 = vst.msk [vmem:[%s4704_s6 + $0x20] sm:$0xff] %vm2586_vm1, %v2572_v45  ;;  %v2575_v56 = vadd.f32 %v3000_v39, %v2574_v52 }
 0x4d3   : > { %2594 = vst.msk [vmem:[%s4704_s6 + $0x38] sm:$0xff] %vm2586_vm1, %v2583_v50 }
 0x4d4   : > { %2592 = vst.msk [vmem:[%s4704_s6 + $0x28] sm:$0xff] %vm2586_vm1, %v2575_v56 }
 0x4d5 PF: > { %s29_s14 = sadd.s32 1, %s3827_s14   ;;  %s4705_s27 = sld [smem:[#allocation18_spill]] }
 0x4d6   : > { %p26_p1 = scmp.ge.s32.totalorder %s29_s14, 5   ;;  %s4706_s11 = sld [smem:[#allocation20_spill]] }
 0x4d7   : > { %s4707_s22 = sld [smem:[#allocation19_spill]]  ;;  %s4708_s30 = smov %s3811_s10 }
 0x4d8   : > { %s4710_s12 = smov %s3823_s13  ;;  %28 = sbr.rel (!%p26_p1) target bundleno = 15 (0xf), region = 163 }
 0x4db   : > { %s4709_s10 = smov %s4705_s27 }
 0x4dd   : > { %s4711_s13 = smov %s4707_s22 }
 0x4df   :  { %2617 = vsyncpa [#allocation4], 1 }
 0x4e0   :  { %2619 = vsyncpa [#allocation4 + $0x1], 1 }
 0x4e1   :  { %2620 = vsyncpa [#allocation6], 1 }
 0x4e2   :  { %2622 = vsyncpa [#allocation6 + $0x1], 1 }
 0x4e3   :  { %2623 = vsyncpa [#allocation9], 1 }
 0x4e4   :  { %2625 = vsyncpa [#allocation9 + $0x1], 1 }
 0x4e5   :  { %2626 = vsyncpa [#allocation12], 1 }

</bundles_post_ra>
